<compile_context>
chip_gen: v5e
topology: v5e:2x2
jax: 0.10.0
libtpu: 0.0.40
codegen_flags: <defaults>
</compile_context>

<pallas_src>
import functools

import jax
import jax.numpy as jnp
from jax.experimental import pallas as pl
from jax.experimental.pallas import tpu as pltpu

ENCODING = 6
D_IN = 3 + 3 * 2 * ENCODING   # 39
FILTER = 128                  # hidden width
D_OUT = 4
D_OUT_PAD = 8                 # pad output channels to a full sublane group (unmasked stores)


def nerf_kernel(x_ref, w1_ref, b1_ref, w2_ref, b2_ref, w3t_ref, b3t_ref, o_ref):
    """Fused 3-layer MLP. bf16 matmul operands, f32 accumulation, f32 elementwise."""
    x = x_ref[...].astype(jnp.bfloat16)                       # (bn, D_IN)

    h1 = jnp.dot(x, w1_ref[...], preferred_element_type=jnp.float32) + b1_ref[...]
    h1 = jnp.maximum(h1, 0.0)                                 # (bn, F) f32

    h2 = jnp.dot(h1.astype(jnp.bfloat16), w2_ref[...],
                 preferred_element_type=jnp.float32) + b2_ref[...]
    h2 = jnp.maximum(h2, 0.0)                                 # (bn, F) f32

    # Lane-dense final layer: contract (D_OUT_PAD, F) with (bn, F) over F -> (D_OUT_PAD, bn),
    # so the batch axis lands on lanes and the store is full unmasked vregs.
    y_t = jax.lax.dot_general(
        w3t_ref[...], h2.astype(jnp.bfloat16),
        dimension_numbers=(((1,), (1,)), ((), ())),
        preferred_element_type=jnp.float32)                   # (D_OUT_PAD, bn)
    o_ref[...] = (y_t + b3t_ref[...]).astype(o_ref.dtype)


@functools.partial(jax.jit, static_argnames=("block_n",))
def nerf_forward(x, params, block_n=1024):
    """x: (N, D_IN) float32. Returns (N, D_OUT) float32."""
    w1, b1, w2, b2, w3, b3 = params
    n = x.shape[0]

    # Ragged-tail handling: pad batch to a multiple of block_n, slice at the end.
    n_pad = block_n * pl.cdiv(n, block_n)
    if n_pad != n:
        x = jnp.pad(x, ((0, n_pad - n), (0, 0)))
    grid = (n_pad // block_n,)

    # bf16 matmul operands; layer-3 weight pre-transposed and padded to 8 output rows.
    w1b = w1.astype(jnp.bfloat16)                                   # (39, 128)
    w2b = w2.astype(jnp.bfloat16)                                   # (128, 128)
    w3t = jnp.pad(w3.T, ((0, D_OUT_PAD - D_OUT), (0, 0))).astype(jnp.bfloat16)  # (8, 128)
    b3t = jnp.pad(b3.reshape(D_OUT, 1), ((0, D_OUT_PAD - D_OUT), (0, 0)))       # (8, 1) f32

    # Whole-array blocks (VMEM-resident across grid steps).
    def full(a):
        return pl.BlockSpec(a.shape, lambda i, _nd=a.ndim: (0,) * _nd)

    flops = 2 * n_pad * (D_IN * FILTER + FILTER * FILTER + FILTER * D_OUT_PAD)
    bytes_accessed = (
        n_pad * D_IN * 4                 # x (f32 in HBM)
        + n_pad * D_OUT_PAD * 4          # transposed output
        + (w1b.size + w2b.size + w3t.size) * 2
        + (b1.size + b2.size + b3t.size) * 4)

    out_t = pl.pallas_call(
        nerf_kernel,
        out_shape=jax.ShapeDtypeStruct((D_OUT_PAD, n_pad), jnp.float32),
        grid_spec=pltpu.PrefetchScalarGridSpec(
            num_scalar_prefetch=0,
            grid=grid,
            in_specs=[
                pl.BlockSpec((block_n, D_IN), lambda i: (i, 0)),   # x tile
                full(w1b), full(b1),
                full(w2b), full(b2),
                full(w3t), full(b3t),
            ],
            out_specs=pl.BlockSpec((D_OUT_PAD, block_n), lambda i: (0, i)),
        ),
        compiler_params=pltpu.CompilerParams(
            dimension_semantics=("parallel",)),
        cost_estimate=pl.CostEstimate(
            flops=flops, transcendentals=0, bytes_accessed=bytes_accessed),
    )(x, w1b, b1, w2b, b2, w3t, b3t)

    # (D_OUT_PAD, n_pad) -> (n, D_OUT)
    return out_t[:D_OUT].T[:n]


def init_params(key):
    """Deterministic init mimicking torch.nn.Linear default (uniform +-1/sqrt(fan_in))."""
    keys = jax.random.split(key, 6)

    def linear(kw, kb, fan_in, fan_out):
        bound = 1.0 / jnp.sqrt(jnp.float32(fan_in))
        w = jax.random.uniform(kw, (fan_in, fan_out), jnp.float32, -bound, bound)
        b = jax.random.uniform(kb, (1, fan_out), jnp.float32, -bound, bound)
        return w, b

    w1, b1 = linear(keys[0], keys[1], D_IN, FILTER)
    w2, b2 = linear(keys[2], keys[3], FILTER, FILTER)
    w3, b3 = linear(keys[4], keys[5], FILTER, D_OUT)
    return (w1, b1, w2, b2, w3, b3)


def reference_forward_f32(x, params):
    w1, b1, w2, b2, w3, b3 = params
    h1 = jnp.maximum(x @ w1 + b1, 0.0)
    h2 = jnp.maximum(h1 @ w2 + b2, 0.0)
    return h2 @ w3 + b3


def reference_forward_bf16(x, params):
    """Mirrors the kernel's numerics: bf16 matmul operands, f32 accumulation/elementwise."""
    w1, b1, w2, b2, w3, b3 = params
    bf = jnp.bfloat16
    h1 = jnp.maximum(
        jnp.dot(x.astype(bf), w1.astype(bf), preferred_element_type=jnp.float32) + b1, 0.0)
    h2 = jnp.maximum(
        jnp.dot(h1.astype(bf), w2.astype(bf), preferred_element_type=jnp.float32) + b2, 0.0)
    return jnp.dot(h2.astype(bf), w3.astype(bf), preferred_element_type=jnp.float32) + b3


if __name__ == "__main__":
    key = jax.random.PRNGKey(0)
    k_x, k_p = jax.random.split(key)

    N = 2500  # not a multiple of block_n -> exercises the ragged-tail path
    x = jax.random.normal(k_x, (N, D_IN), dtype=jnp.float32)
    params = init_params(k_p)

    out = nerf_forward(x, params)
    out = jax.block_until_ready(out)
    assert out.shape == (N, D_OUT)

    ref_bf16 = reference_forward_bf16(x, params)
    ref_f32 = reference_forward_f32(x, params)
    # Tight check against a reference with identical numerics (bf16 operands, f32 accum).
    assert jnp.allclose(out, ref_bf16, atol=2e-3, rtol=2e-3)
    # Loose check against the pure-f32 PyTorch-equivalent forward.
    assert jnp.allclose(out, ref_f32, atol=5e-2, rtol=5e-2)

    print("KERNEL_OK")
</pallas_src>

<mosaic_0001>
module attributes {stable_mosaic.version = 11 : i64} {
  func.func @nerf_kernel(%arg0: i32, %arg1: memref<1024x39xf32, #tpu.memory_space<vmem>>, %arg2: memref<39x128xbf16, #tpu.memory_space<vmem>>, %arg3: memref<1x128xf32, #tpu.memory_space<vmem>>, %arg4: memref<128x128xbf16, #tpu.memory_space<vmem>>, %arg5: memref<1x128xf32, #tpu.memory_space<vmem>>, %arg6: memref<8x128xbf16, #tpu.memory_space<vmem>>, %arg7: memref<8x1xf32, #tpu.memory_space<vmem>>, %arg8: memref<8x1024xf32, #tpu.memory_space<vmem>>) attributes {dimension_semantics = [#tpu.dimension_semantics<parallel>], iteration_bounds = array<i64: 3>, scalar_prefetch = 0 : i64, scratch_operands = 0 : i64, tpu.core_type = #tpu.core_type<tc>, window_params = [{transform_indices = @transform_0, window_bounds = array<i64: 1024, 39>}, {pipeline_mode = #tpu.pipeline_mode<synchronous>, transform_indices = @transform_1, window_bounds = array<i64: 39, 128>}, {pipeline_mode = #tpu.pipeline_mode<synchronous>, transform_indices = @transform_2, window_bounds = array<i64: 1, 128>}, {pipeline_mode = #tpu.pipeline_mode<synchronous>, transform_indices = @transform_3, window_bounds = array<i64: 128, 128>}, {pipeline_mode = #tpu.pipeline_mode<synchronous>, transform_indices = @transform_4, window_bounds = array<i64: 1, 128>}, {pipeline_mode = #tpu.pipeline_mode<synchronous>, transform_indices = @transform_5, window_bounds = array<i64: 8, 128>}, {pipeline_mode = #tpu.pipeline_mode<synchronous>, transform_indices = @transform_6, window_bounds = array<i64: 8, 1>}, {transform_indices = @transform_7, window_bounds = array<i64: 8, 1024>}]} {
    %c0 = arith.constant 0 : index
    %c0_0 = arith.constant 0 : index
    %0 = vector.load %arg1[%c0, %c0_0] : memref<1024x39xf32, #tpu.memory_space<vmem>>, vector<1024x39xf32>
    %1 = arith.truncf %0 : vector<1024x39xf32> to vector<1024x39xbf16>
    %c0_1 = arith.constant 0 : index
    %c0_2 = arith.constant 0 : index
    %2 = vector.load %arg2[%c0_1, %c0_2] : memref<39x128xbf16, #tpu.memory_space<vmem>>, vector<39x128xbf16>
    %cst = arith.constant dense<0.000000e+00> : vector<1024x128xf32>
    %3 = tpu.matmul %1, %2, %cst {dimension_numbers = #tpu.dot_dimension_numbers<[1], [0], [0], [1], [0, 0, 1, 1], [], []>} : vector<1024x39xbf16>, vector<39x128xbf16>, vector<1024x128xf32> -> vector<1024x128xf32>
    %c0_3 = arith.constant 0 : index
    %c0_4 = arith.constant 0 : index
    %4 = vector.load %arg3[%c0_3, %c0_4] : memref<1x128xf32, #tpu.memory_space<vmem>>, vector<1x128xf32>
    %5 = vector.broadcast %4 : vector<1x128xf32> to vector<1024x128xf32>
    %6 = arith.addf %3, %5 : vector<1024x128xf32>
    %cst_5 = arith.constant 0.000000e+00 : f32
    %7 = vector.broadcast %cst_5 : f32 to vector<1024x128xf32>
    %8 = arith.maximumf %6, %7 : vector<1024x128xf32>
    %9 = arith.truncf %8 : vector<1024x128xf32> to vector<1024x128xbf16>
    %c0_6 = arith.constant 0 : index
    %c0_7 = arith.constant 0 : index
    %10 = vector.load %arg4[%c0_6, %c0_7] : memref<128x128xbf16, #tpu.memory_space<vmem>>, vector<128x128xbf16>
    %cst_8 = arith.constant dense<0.000000e+00> : vector<1024x128xf32>
    %11 = tpu.matmul %9, %10, %cst_8 {dimension_numbers = #tpu.dot_dimension_numbers<[1], [0], [0], [1], [0, 0, 1, 1], [], []>} : vector<1024x128xbf16>, vector<128x128xbf16>, vector<1024x128xf32> -> vector<1024x128xf32>
    %c0_9 = arith.constant 0 : index
    %c0_10 = arith.constant 0 : index
    %12 = vector.load %arg5[%c0_9, %c0_10] : memref<1x128xf32, #tpu.memory_space<vmem>>, vector<1x128xf32>
    %13 = vector.broadcast %12 : vector<1x128xf32> to vector<1024x128xf32>
    %14 = arith.addf %11, %13 : vector<1024x128xf32>
    %cst_11 = arith.constant 0.000000e+00 : f32
    %15 = vector.broadcast %cst_11 : f32 to vector<1024x128xf32>
    %16 = arith.maximumf %14, %15 : vector<1024x128xf32>
    %c0_12 = arith.constant 0 : index
    %c0_13 = arith.constant 0 : index
    %17 = vector.load %arg6[%c0_12, %c0_13] : memref<8x128xbf16, #tpu.memory_space<vmem>>, vector<8x128xbf16>
    %18 = arith.truncf %16 : vector<1024x128xf32> to vector<1024x128xbf16>
    %cst_14 = arith.constant dense<0.000000e+00> : vector<8x1024xf32>
    %19 = tpu.matmul %17, %18, %cst_14 {dimension_numbers = #tpu.dot_dimension_numbers<[1], [1], [0], [0], [0, 0, 1, 0], [], []>} : vector<8x128xbf16>, vector<1024x128xbf16>, vector<8x1024xf32> -> vector<8x1024xf32>
    %c0_15 = arith.constant 0 : index
    %c0_16 = arith.constant 0 : index
    %20 = vector.load %arg7[%c0_15, %c0_16] : memref<8x1xf32, #tpu.memory_space<vmem>>, vector<8x1xf32>
    %21 = vector.broadcast %20 : vector<8x1xf32> to vector<8x1024xf32>
    %22 = arith.addf %19, %21 : vector<8x1024xf32>
    %c0_17 = arith.constant 0 : index
    %c0_18 = arith.constant 0 : index
    %23 = vector.load %arg8[%c0_17, %c0_18] : memref<8x1024xf32, #tpu.memory_space<vmem>>, vector<8x1024xf32>
    tpu.vector_store %arg8[%c0_17, %c0_18], %22 {strides = array<i32>} : memref<8x1024xf32, #tpu.memory_space<vmem>>, vector<8x1024xf32>,
    return
  }
  func.func @transform_0(%arg0: i32) -> (i32, i32) {
    %c0_i32 = arith.constant 0 : i32
    %c0_i32_0 = arith.constant 0 : i32
    return %arg0, %c0_i32 : i32, i32
  }
  func.func @transform_1(%arg0: i32) -> (i32, i32) {
    %c0_i32 = arith.constant 0 : i32
    %c0_i32_0 = arith.constant 0 : i32
    %c0_i32_1 = arith.constant 0 : i32
    return %c0_i32, %c0_i32_0 : i32, i32
  }
  func.func @transform_2(%arg0: i32) -> (i32, i32) {
    %c0_i32 = arith.constant 0 : i32
    %c0_i32_0 = arith.constant 0 : i32
    %c0_i32_1 = arith.constant 0 : i32
    return %c0_i32, %c0_i32_0 : i32, i32
  }
  func.func @transform_3(%arg0: i32) -> (i32, i32) {
    %c0_i32 = arith.constant 0 : i32
    %c0_i32_0 = arith.constant 0 : i32
    %c0_i32_1 = arith.constant 0 : i32
    return %c0_i32, %c0_i32_0 : i32, i32
  }
  func.func @transform_4(%arg0: i32) -> (i32, i32) {
    %c0_i32 = arith.constant 0 : i32
    %c0_i32_0 = arith.constant 0 : i32
    %c0_i32_1 = arith.constant 0 : i32
    return %c0_i32, %c0_i32_0 : i32, i32
  }
  func.func @transform_5(%arg0: i32) -> (i32, i32) {
    %c0_i32 = arith.constant 0 : i32
    %c0_i32_0 = arith.constant 0 : i32
    %c0_i32_1 = arith.constant 0 : i32
    return %c0_i32, %c0_i32_0 : i32, i32
  }
  func.func @transform_6(%arg0: i32) -> (i32, i32) {
    %c0_i32 = arith.constant 0 : i32
    %c0_i32_0 = arith.constant 0 : i32
    %c0_i32_1 = arith.constant 0 : i32
    return %c0_i32, %c0_i32_0 : i32, i32
  }
  func.func @transform_7(%arg0: i32) -> (i32, i32) {
    %c0_i32 = arith.constant 0 : i32
    %c0_i32_0 = arith.constant 0 : i32
    return %c0_i32, %arg0 : i32, i32
  }
}

</mosaic_0001>

<bundles_post_ra>
// kernel: nerf_forward.1
= control target key start
LH: loop header
LB: loop body
LE: loop exit
PB: predicated region body
PF: predicated region fallthrough
CT: control target
= control target key end

     0   :  { %s2187_s24 = smov 0   ;;  %s2881_s0 = inlined_call_operand.vmem [shape: f32[3072,39], index: 0, kind: input, shape index: {}]   ;;  %s2882_s1 = inlined_call_operand.vmem [shape: bf16[39,128], index: 1, kind: input, shape index: {}]   ;;  %s2883_s2 = inlined_call_operand.vmem [shape: f32[1,128], index: 2, kind: input, shape index: {}]   ;;  %s2884_s3 = inlined_call_operand.vmem [shape: bf16[128,128], index: 3, kind: input, shape index: {}]   ;;  %s2885_s4 = inlined_call_operand.vmem [shape: f32[1,128], index: 4, kind: input, shape index: {}]   ;;  %s2886_s5 = inlined_call_operand.vmem [shape: bf16[8,128], index: 5, kind: input, shape index: {}]   ;;  %s2887_s6 = inlined_call_operand.vmem [shape: f32[8,1], index: 6, kind: input, shape index: {}]   ;;  %s2888_s7 = inlined_call_operand.vmem [shape: f32[8,3072], index: 7, kind: output, shape index: {}]  }
   0x1 LB: > { %s1984_s25 = sadd.s32 4294967295, %s2143_s24   ;;  %p1988_p0 = scmp.ge.s32.totalorder %s2143_s24, 1  ;;  %s2143_s24 = sphi %s2187_s24, %s17_s24  }
   0x2   : > { %p238_p1 = scmp.lt.s32.totalorder %s2143_s24, 4 }
   0x4   : > { %p239_p2 = pnand %p1988_p0, %p238_p1 }
   0x5   : > { %s1989_s28 = sshll.u32 (!%p239_p2), %s1984_s25, 7  ;;  %s1991_s27 = sshll.u32 (!%p239_p2), %s1984_s25, 3 }
   0x6   : > { %242 = sbr.rel (%p239_p2) target bundleno = 1526 (0x5f6), region = 48  ;;  %p271_p3 = scmp.lt.s32.totalorder (!%p239_p2), %s1989_s28, 383 }
   0x7   : > { %p277_p4 = scmp.lt.s32.totalorder (!%p239_p2), %s1991_s27, 23 }
   0xb   : > { %v479_v0 = vld [vmem:[%s2882_s1 + $0x10] sm:$0xf]  ;;  %vm692_vm0 = vcmask 1042432   ;;  %vm693_vm1 = vcmask 1043456   ;;  %v2145_v2 = vmov 65535   ;;  %s2890_s28 = smov (!%p271_p3, %s1989_s28), 383 }
   0xc   : > { %v493_v1 = vunpack.c.l.b16 %v479_v0  ;;  %v694_v3 = vsel %vm692_vm0, 4294967295, %v2145_v2  ;;  %s1990_s29 = sshll.u32 %s2890_s28, 3  ;;  %v2100_v7 = vld [vmem:[%s2882_s1 + $0x8] sm:$0xff]  ;;  %v2099_v8 = vld [vmem:[%s2882_s1] sm:$0xff]  ;;  %vm499_vm2 = vcmask 318464   ;;  %v2108_v24 = vld [vmem:[%s2884_s3 + $0x38] sm:$0xff] }
   0xd   : > { %v695_v4 = vsel %vm693_vm1, %v694_v3, 0  ;;  %s2206_s11 = scalar_lea.vmem %s2881_s0, %s1990_s29  ;;  %1288 = vmatpush.bf16.msra.mxu1 %v2108_v24  ;;  %2112 = vmatpush.bf16.msra.mxu2 %v2108_v24  ;;  %v2107_v28 = vld [vmem:[%s2884_s3 + $0x30] sm:$0xff]  ;;  %v2106_v29 = vld [vmem:[%s2884_s3 + $0x28] sm:$0xff]  ;;  %v2105_v30 = vld [vmem:[%s2884_s3 + $0x20] sm:$0xff]  ;;  %s2892_s27 = smov (!%p277_p4, %s1991_s27), 23 }
   0xe   : > { %v496_v5 = vpack.c.b16 %v493_v1, %v493_v1  ;;  %v283_v9 = vld [vmem:[%s2206_s11] sm:$0xff]  ;;  %v284_v10 = vld [vmem:[%s2206_s11 + $0x8] sm:$0xff]  ;;  %v285_v12 = vld [vmem:[%s2206_s11 + $0x10] sm:$0xff]  ;;  %s1992_s28 = sshll.u32 %s2892_s27, 3 }
   0xf   : > { %v411_v11 = vpack.c.bf16 %v284_v10, %v283_v9  ;;  %v286_v13 = vld [vmem:[%s2206_s11 + $0x18] sm:$0xff]  ;;  %v287_v15 = vld [vmem:[%s2206_s11 + $0x20] sm:$0xff]  ;;  %v288_v16 = vld [vmem:[%s2206_s11 + $0x28] sm:$0xff]  ;;  %s280_s8 = scalar_lea.vmem %s2888_s7, %s1992_s28 }
  0x10   : > { %v697_v6 = vand.u32 %v695_v4, %v496_v5  ;;  %v412_v14 = vpack.c.bf16 %v286_v13, %v285_v12  ;;  %v413_v17 = vpack.c.bf16 %v288_v16, %v287_v15  ;;  %v289_v18 = vld [vmem:[%s2206_s11 + $0x30] sm:$0xff]  ;;  %v290_v19 = vld [vmem:[%s2206_s11 + $0x38] sm:$0xff]  ;;  %v291_v21 = vld [vmem:[%s2206_s11 + $0x40] sm:$0xff] }
  0x11   : > { %v414_v20 = vpack.c.bf16 %v290_v19, %v289_v18  ;;  %v292_v22 = vld [vmem:[%s2206_s11 + $0x48] sm:$0xff]  ;;  %v293_v25 = vld [vmem:[%s2206_s11 + $0x50] sm:$0xff]  ;;  %v294_v26 = vld [vmem:[%s2206_s11 + $0x58] sm:$0xff]  ;;  %1289 = vmatpush.bf16.msra.mxu1 %v2107_v28  ;;  %2113 = vmatpush.bf16.msra.mxu2 %v2107_v28 }
  0x12   : > { %704 = vmatpush.bf16.msra.mxu0 %v697_v6  ;;  %2109 = vmatpush.bf16.msra.mxu3 %v697_v6  ;;  %v415_v23 = vpack.c.bf16 %v292_v22, %v291_v21  ;;  %v416_v27 = vpack.c.bf16 %v294_v26, %v293_v25  ;;  %v295_v31 = vld [vmem:[%s2206_s11 + $0x60] sm:$0xff]  ;;  %v296_v32 = vld [vmem:[%s2206_s11 + $0x68] sm:$0xff]  ;;  %v2104_v33 = vld [vmem:[%s2884_s3 + $0x18] sm:$0xff] }
  0x13   : > { %v417_v34 = vpack.c.bf16 %v296_v32, %v295_v31  ;;  %v2103_v35 = vld [vmem:[%s2884_s3 + $0x10] sm:$0xff]  ;;  %v2102_v36 = vld [vmem:[%s2884_s3 + $0x8] sm:$0xff]  ;;  %v2101_v37 = vld [vmem:[%s2884_s3] sm:$0xff] }
  0x14   : > { %v297_v38 = vld [vmem:[%s2206_s11 + $0x70] sm:$0xff]  ;;  %v298_v39 = vld [vmem:[%s2206_s11 + $0x78] sm:$0xff]  ;;  %v299_v41 = vld [vmem:[%s2206_s11 + $0x80] sm:$0xff] }
  0x15   : > { %1290 = vmatpush.bf16.msra.mxu1 %v2106_v29  ;;  %2114 = vmatpush.bf16.msra.mxu2 %v2106_v29  ;;  %v418_v40 = vpack.c.bf16 %v298_v39, %v297_v38  ;;  %v300_v42 = vld [vmem:[%s2206_s11 + $0x88] sm:$0xff]  ;;  %v2264_v45 = vld [vmem:[%s2883_s2] ss:$0 sm:$0xff]  ;;  %v301_v51 = vld [vmem:[%s2206_s11 + $0x90] sm:$0xff] }
  0x16   : > { %705 = vmatpush.bf16.msra.mxu0 %v2100_v7  ;;  %2110 = vmatpush.bf16.msra.mxu3 %v2100_v7  ;;  %v419_v43 = vpack.c.bf16 %v300_v42, %v299_v41  ;;  %v302_v52 = vld [vmem:[%s2206_s11 + $0x98] sm:$0xff]  ;;  %v303_v61 = vld [vmem:[%s2206_s11 + $0xa0] sm:$0xff]  ;;  %v304_v62 = vld [vmem:[%s2206_s11 + $0xa8] sm:$0xff] }
  0x17   : > { %v420_v54 = vpack.c.bf16 %v302_v52, %v301_v51  ;;  %v421_v0 = vpack.c.bf16 %v304_v62, %v303_v61  ;;  %v305_v7 = vld [vmem:[%s2206_s11 + $0xb0] sm:$0xff]  ;;  %v308_v18 = vld [vmem:[%s2206_s11 + $0xc8] sm:$0xff]  ;;  %v310_v28 = vld [vmem:[%s2206_s11 + $0xd8] sm:$0xff] }
  0x18   : > { %v312_v38 = vld [vmem:[%s2206_s11 + $0xe8] sm:$0xff] }
  0x19   : > { %1291 = vmatpush.bf16.msra.mxu1 %v2105_v30  ;;  %2115 = vmatpush.bf16.msra.mxu2 %v2105_v30 }
  0x1a   : > { %706 = vmatpush.bf16.msra.mxu0 %v2099_v8  ;;  %2111 = vmatpush.bf16.msra.mxu3 %v2099_v8  ;;  %v306_v8 = vld [vmem:[%s2206_s11 + $0xb8] sm:$0xff] }
  0x1b   : > { %v422_v10 = vpack.c.bf16 %v306_v8, %v305_v7  ;;  %v2314_v8 = vld [vmem:[%s2885_s4] ss:$0 sm:$0xff] }
  0x1d   : > { %2001 = vmatmul.msk.bf16.vlgmr.msra.gmra.mxu0 %vm499_vm2, %v411_v11  ;;  %1292 = vmatpush.bf16.msra.mxu1 %v2104_v33 }
  0x1e   : > { %2116 = vmatpush.bf16.msra.mxu2 %v2104_v33 }
  0x21   : > { %1293 = vmatpush.bf16.msra.mxu1 %v2103_v35 }
  0x22   : > { %2117 = vmatpush.bf16.msra.mxu2 %v2103_v35 }
  0x25   : > { %1294 = vmatpush.bf16.msra.mxu1 %v2102_v36 }
  0x26   : > { %2118 = vmatpush.bf16.msra.mxu2 %v2102_v36 }
  0x29   : > { %1295 = vmatpush.bf16.msra.mxu1 %v2101_v37 }
  0x2a   : > { %2119 = vmatpush.bf16.msra.mxu2 %v2101_v37  ;;  %v311_v37 = vld [vmem:[%s2206_s11 + $0xe0] sm:$0xff] }
  0x2d   : > { %2002 = vmatmul.msk.bf16.gmra.mxu0 %vm499_vm2, %v412_v14 }
  0x3d   : > { %2003 = vmatmul.msk.bf16.gmra.mxu0 %vm499_vm2, %v413_v17  ;;  %v307_v17 = vld [vmem:[%s2206_s11 + $0xc0] sm:$0xff] }
  0x4d   : > { %2004 = vmatmul.msk.bf16.gmra.mxu0 %vm499_vm2, %v414_v20  ;;  %v423_v20 = vpack.c.bf16 %v308_v18, %v307_v17 }
  0x5d   : > { %2005 = vmatmul.msk.bf16.gmra.mxu0 %vm499_vm2, %v415_v23 }
  0x6d   : > { %2006 = vmatmul.msk.bf16.gmra.mxu0 %vm499_vm2, %v416_v27  ;;  %v309_v27 = vld [vmem:[%s2206_s11 + $0xd0] sm:$0xff] }
  0x6e   : > { %v424_v30 = vpack.c.bf16 %v310_v28, %v309_v27 }
  0x7d   : > { %2007 = vmatmul.msk.bf16.gmra.mxu0 %vm499_vm2, %v417_v34 }
  0x8d   : > { %2008 = vmatmul.msk.bf16.gmra.mxu0 %vm499_vm2, %v418_v40  ;;  %v425_v40 = vpack.c.bf16 %v312_v38, %v311_v37 }
  0x9a   : > { %v708_v44 = vpop.f32.mrf.mxu0 }
  0x9b   : > { %v709_v46 = vadd.f32 %v2264_v45, %v708_v44 }
  0x9d   : > { %2009 = vmatmul.msk.bf16.gmra.mxu0 %vm499_vm2, %v419_v43  ;;  %v1028_v49 = vmax.f32 %v709_v46, 0.0 }
  0xa2   : > { %v710_v47 = vpop.f32.mrf.mxu0 }
  0xa3   : > { %v711_v48 = vadd.f32 %v2264_v45, %v710_v47 }
  0xa5   : > { %v1029_v50 = vmax.f32 %v711_v48, 0.0  ;;  %v313_v48 = vld [vmem:[%s2206_s11 + $0xf0] sm:$0xff] }
  0xa7   : > { %v1156_v53 = vpack.c.bf16 %v1029_v50, %v1028_v49  ;;  %v314_v49 = vld [vmem:[%s2206_s11 + $0xf8] sm:$0xff] }
  0xa8   : > { %v426_v51 = vpack.c.bf16 %v314_v49, %v313_v48 }
  0xa9   : > { %1296 = vmatmul.bf16.vlgmr.msra.gmra.mxu1 %v1156_v53 }
  0xaa   : > { %v713_v55 = vpop.f32.mrf.mxu0 }
  0xab   : > { %v714_v56 = vadd.f32 %v2264_v45, %v713_v55 }
  0xad   : > { %2010 = vmatmul.msk.bf16.gmra.mxu0 %vm499_vm2, %v420_v54  ;;  %v1030_v59 = vmax.f32 %v714_v56, 0.0 }
  0xb2   : > { %v715_v57 = vpop.f32.mrf.mxu0 }
  0xb3   : > { %v716_v58 = vadd.f32 %v2264_v45, %v715_v57 }
  0xb5   : > { %v1031_v60 = vmax.f32 %v716_v58, 0.0  ;;  %v315_v58 = vld [vmem:[%s2206_s11 + $0x100] sm:$0xff] }
  0xb7   : > { %v1157_v63 = vpack.c.bf16 %v1031_v60, %v1030_v59  ;;  %v316_v59 = vld [vmem:[%s2206_s11 + $0x108] sm:$0xff] }
  0xb8   : > { %v427_v61 = vpack.c.bf16 %v316_v59, %v315_v58  ;;  %v323_v58 = vld [vmem:[%s2206_s11 + $0x140] sm:$0xff]  ;;  %v324_v59 = vld [vmem:[%s2206_s11 + $0x148] sm:$0xff] }
  0xb9   : > { %1301 = vmatmul.bf16.gmra.mxu1 %v1157_v63 }
  0xba   : > { %v718_v1 = vpop.f32.mrf.mxu0 }
  0xbb   : > { %v719_v2 = vadd.f32 %v2264_v45, %v718_v1 }
  0xbd   : > { %2011 = vmatmul.msk.bf16.gmra.mxu0 %vm499_vm2, %v421_v0  ;;  %v1032_v5 = vmax.f32 %v719_v2, 0.0 }
  0xc2   : > { %v720_v3 = vpop.f32.mrf.mxu0 }
  0xc3   : > { %v721_v4 = vadd.f32 %v2264_v45, %v720_v3 }
  0xc5   : > { %v1033_v6 = vmax.f32 %v721_v4, 0.0 }
  0xc7   : > { %v1158_v9 = vpack.c.bf16 %v1033_v6, %v1032_v5  ;;  %v317_v5 = vld [vmem:[%s2206_s11 + $0x110] sm:$0xff]  ;;  %v318_v6 = vld [vmem:[%s2206_s11 + $0x118] sm:$0xff] }
  0xc9   : > { %1306 = vmatmul.bf16.gmra.mxu1 %v1158_v9  ;;  %v428_v9 = vpack.c.bf16 %v318_v6, %v317_v5 }
  0xca   : > { %v723_v11 = vpop.f32.mrf.mxu0 }
  0xcb   : > { %v724_v12 = vadd.f32 %v2264_v45, %v723_v11 }
  0xcd   : > { %2012 = vmatmul.msk.bf16.gmra.mxu0 %vm499_vm2, %v422_v10  ;;  %v1034_v15 = vmax.f32 %v724_v12, 0.0 }
  0xd2   : > { %v725_v13 = vpop.f32.mrf.mxu0 }
  0xd3   : > { %v726_v14 = vadd.f32 %v2264_v45, %v725_v13 }
  0xd5   : > { %v1035_v16 = vmax.f32 %v726_v14, 0.0 }
  0xd7   : > { %v1159_v19 = vpack.c.bf16 %v1035_v16, %v1034_v15 }
  0xd9   : > { %1311 = vmatmul.bf16.gmra.mxu1 %v1159_v19 }
  0xda   : > { %v728_v21 = vpop.f32.mrf.mxu0 }
  0xdb   : > { %v729_v22 = vadd.f32 %v2264_v45, %v728_v21 }
  0xdd   : > { %2013 = vmatmul.msk.bf16.gmra.mxu0 %vm499_vm2, %v423_v20  ;;  %v1036_v25 = vmax.f32 %v729_v22, 0.0 }
  0xe2   : > { %v730_v23 = vpop.f32.mrf.mxu0 }
  0xe3   : > { %v731_v24 = vadd.f32 %v2264_v45, %v730_v23  ;;  %v319_v23 = vld [vmem:[%s2206_s11 + $0x120] sm:$0xff] }
  0xe5   : > { %v1037_v26 = vmax.f32 %v731_v24, 0.0  ;;  %v320_v24 = vld [vmem:[%s2206_s11 + $0x128] sm:$0xff] }
  0xe7   : > { %v1160_v29 = vpack.c.bf16 %v1037_v26, %v1036_v25  ;;  %v429_v26 = vpack.c.bf16 %v320_v24, %v319_v23 }
  0xe9   : > { %1316 = vmatmul.bf16.gmra.mxu1 %v1160_v29 }
  0xea   : > { %v733_v31 = vpop.f32.mrf.mxu0 }
  0xeb   : > { %v734_v32 = vadd.f32 %v2264_v45, %v733_v31 }
  0xed   : > { %2014 = vmatmul.msk.bf16.gmra.mxu0 %vm499_vm2, %v424_v30  ;;  %v1038_v35 = vmax.f32 %v734_v32, 0.0 }
  0xf2   : > { %v735_v33 = vpop.f32.mrf.mxu0 }
  0xf3   : > { %v736_v34 = vadd.f32 %v2264_v45, %v735_v33 }
  0xf5   : > { %v1039_v36 = vmax.f32 %v736_v34, 0.0 }
  0xf7   : > { %v1161_v39 = vpack.c.bf16 %v1039_v36, %v1038_v35 }
  0xf9   : > { %1321 = vmatmul.bf16.gmra.mxu1 %v1161_v39 }
  0xfa   : > { %v738_v41 = vpop.f32.mrf.mxu0 }
  0xfb   : > { %v739_v42 = vadd.f32 %v2264_v45, %v738_v41  ;;  %v322_v41 = vld [vmem:[%s2206_s11 + $0x138] sm:$0xff] }
  0xfd   : > { %2015 = vmatmul.msk.bf16.gmra.mxu0 %vm499_vm2, %v425_v40  ;;  %v1040_v46 = vmax.f32 %v739_v42, 0.0  ;;  %v321_v40 = vld [vmem:[%s2206_s11 + $0x130] sm:$0xff] }
 0x102   : > { %v740_v43 = vpop.f32.mrf.mxu0 }
 0x103   : > { %v741_v44 = vadd.f32 %v2264_v45, %v740_v43  ;;  %v430_v43 = vpack.c.bf16 %v322_v41, %v321_v40 }
 0x105   : > { %v1041_v47 = vmax.f32 %v741_v44, 0.0 }
 0x107   : > { %v1162_v50 = vpack.c.bf16 %v1041_v47, %v1040_v46 }
 0x109   : > { %1326 = vmatmul.bf16.gmra.mxu1 %v1162_v50 }
 0x10a   : > { %v743_v52 = vpop.f32.mrf.mxu0 }
 0x10b   : > { %v744_v53 = vadd.f32 %v2264_v45, %v743_v52 }
 0x10d   : > { %2016 = vmatmul.msk.bf16.gmra.mxu0 %vm499_vm2, %v426_v51  ;;  %v1042_v56 = vmax.f32 %v744_v53, 0.0 }
 0x112   : > { %v745_v54 = vpop.f32.mrf.mxu0 }
 0x113   : > { %v746_v55 = vadd.f32 %v2264_v45, %v745_v54 }
 0x115   : > { %v1043_v57 = vmax.f32 %v746_v55, 0.0 }
 0x117   : > { %v1163_v60 = vpack.c.bf16 %v1043_v57, %v1042_v56 }
 0x119   : > { %1331 = vmatmul.bf16.gmra.mxu1 %v1163_v60 }
 0x11a   : > { %v748_v62 = vpop.f32.mrf.mxu0 }
 0x11b   : > { %v749_v63 = vadd.f32 %v2264_v45, %v748_v62 }
 0x11d   : > { %2017 = vmatmul.msk.bf16.gmra.mxu0 %vm499_vm2, %v427_v61  ;;  %v1044_v2 = vmax.f32 %v749_v63, 0.0  ;;  %v431_v61 = vpack.c.bf16 %v324_v59, %v323_v58  ;;  %v332_v58 = vld [vmem:[%s2206_s11 + $0x188] sm:$0xff] }
 0x122   : > { %v750_v0 = vpop.f32.mrf.mxu0 }
 0x123   : > { %v751_v1 = vadd.f32 %v2264_v45, %v750_v0 }
 0x125   : > { %v1045_v3 = vmax.f32 %v751_v1, 0.0 }
 0x126   : > { %v1297_v4 = vpop.f32.mrf.mxu1 }
 0x127   : > { %v1164_v7 = vpack.c.bf16 %v1045_v3, %v1044_v2  ;;  %v1298_v11 = vadd.f32 %v2314_v8, %v1297_v4 }
 0x129   : > { %1336 = vmatmul.bf16.gmra.mxu1 %v1164_v7  ;;  %v1617_v14 = vmax.f32 %v1298_v11, 0.0 }
 0x12a   : > { %v753_v10 = vpop.f32.mrf.mxu0 }
 0x12b   : > { %v754_v15 = vadd.f32 %v2264_v45, %v753_v10 }
 0x12d   : > { %2018 = vmatmul.msk.bf16.gmra.mxu0 %vm499_vm2, %v428_v9  ;;  %v1046_v20 = vmax.f32 %v754_v15, 0.0 }
 0x12e   : > { %v1299_v12 = vpop.f32.mrf.mxu1 }
 0x12f   : > { %v1300_v13 = vadd.f32 %v2314_v8, %v1299_v12  ;;  %v325_v12 = vld [vmem:[%s2206_s11 + $0x150] sm:$0xff] }
 0x131   : > { %v1618_v16 = vmax.f32 %v1300_v13, 0.0  ;;  %v326_v13 = vld [vmem:[%s2206_s11 + $0x158] sm:$0xff] }
 0x132   : > { %v755_v17 = vpop.f32.mrf.mxu0  ;;  %v432_v15 = vpack.c.bf16 %v326_v13, %v325_v12 }
 0x133   : > { %v756_v18 = vadd.f32 %v2264_v45, %v755_v17  ;;  %v2321_v19 = vpack.c.bf16 %v1618_v16, %v1617_v14 }
 0x135   : > { %v1047_v21 = vmax.f32 %v756_v18, 0.0 }
 0x136   : > { %v1302_v22 = vpop.f32.mrf.mxu1 }
 0x137   : > { %v1165_v25 = vpack.c.bf16 %v1047_v21, %v1046_v20  ;;  %v1303_v28 = vadd.f32 %v2314_v8, %v1302_v22 }
 0x139   : > { %1341 = vmatmul.bf16.gmra.mxu1 %v1165_v25  ;;  %v1619_v31 = vmax.f32 %v1303_v28, 0.0 }
 0x13a   : > { %v758_v27 = vpop.f32.mrf.mxu0 }
 0x13b   : > { %v759_v32 = vadd.f32 %v2264_v45, %v758_v27 }
 0x13d   : > { %2019 = vmatmul.msk.bf16.gmra.mxu0 %vm499_vm2, %v429_v26  ;;  %v1048_v37 = vmax.f32 %v759_v32, 0.0 }
 0x13e   : > { %v1304_v29 = vpop.f32.mrf.mxu1 }
 0x13f   : > { %v1305_v30 = vadd.f32 %v2314_v8, %v1304_v29 }
 0x141   : > { %v1620_v33 = vmax.f32 %v1305_v30, 0.0  ;;  %v327_v30 = vld [vmem:[%s2206_s11 + $0x160] sm:$0xff] }
 0x142   : > { %v760_v34 = vpop.f32.mrf.mxu0 }
 0x143   : > { %v761_v35 = vadd.f32 %v2264_v45, %v760_v34  ;;  %v2330_v36 = vpack.c.bf16 %v1620_v33, %v1619_v31  ;;  %v328_v31 = vld [vmem:[%s2206_s11 + $0x168] sm:$0xff] }
 0x144   : > { %v433_v33 = vpack.c.bf16 %v328_v31, %v327_v30 }
 0x145   : > { %v1049_v38 = vmax.f32 %v761_v35, 0.0 }
 0x146   : > { %v1307_v39 = vpop.f32.mrf.mxu1 }
 0x147   : > { %v1166_v42 = vpack.c.bf16 %v1049_v38, %v1048_v37  ;;  %v1308_v46 = vadd.f32 %v2314_v8, %v1307_v39 }
 0x149   : > { %1346 = vmatmul.bf16.gmra.mxu1 %v1166_v42  ;;  %v1621_v49 = vmax.f32 %v1308_v46, 0.0 }
 0x14a   : > { %v763_v44 = vpop.f32.mrf.mxu0 }
 0x14b   : > { %v764_v50 = vadd.f32 %v2264_v45, %v763_v44  ;;  %v330_v44 = vld [vmem:[%s2206_s11 + $0x178] sm:$0xff] }
 0x14d   : > { %2020 = vmatmul.msk.bf16.gmra.mxu0 %vm499_vm2, %v430_v43  ;;  %v1050_v55 = vmax.f32 %v764_v50, 0.0  ;;  %v329_v43 = vld [vmem:[%s2206_s11 + $0x170] sm:$0xff] }
 0x14e   : > { %v1309_v47 = vpop.f32.mrf.mxu1 }
 0x14f   : > { %v1310_v48 = vadd.f32 %v2314_v8, %v1309_v47  ;;  %v434_v47 = vpack.c.bf16 %v330_v44, %v329_v43  ;;  %v336_v43 = vld [vmem:[%s2206_s11 + $0x1a8] sm:$0xff] }
 0x151   : > { %v1622_v51 = vmax.f32 %v1310_v48, 0.0 }
 0x152   : > { %v765_v52 = vpop.f32.mrf.mxu0 }
 0x153   : > { %v766_v53 = vadd.f32 %v2264_v45, %v765_v52  ;;  %v2339_v54 = vpack.c.bf16 %v1622_v51, %v1621_v49 }
 0x155   : > { %v1051_v56 = vmax.f32 %v766_v53, 0.0 }
 0x156   : > { %v1312_v57 = vpop.f32.mrf.mxu1 }
 0x157   : > { %v1167_v60 = vpack.c.bf16 %v1051_v56, %v1050_v55  ;;  %v1313_v63 = vadd.f32 %v2314_v8, %v1312_v57  ;;  %v331_v57 = vld [vmem:[%s2206_s11 + $0x180] sm:$0xff] }
 0x159   : > { %1351 = vmatmul.bf16.gmra.mxu1 %v1167_v60  ;;  %v1623_v2 = vmax.f32 %v1313_v63, 0.0  ;;  %v435_v60 = vpack.c.bf16 %v332_v58, %v331_v57 }
 0x15a   : > { %v768_v62 = vpop.f32.mrf.mxu0 }
 0x15b   : > { %v769_v3 = vadd.f32 %v2264_v45, %v768_v62 }
 0x15d   : > { %2021 = vmatmul.msk.bf16.gmra.mxu0 %vm499_vm2, %v431_v61  ;;  %v1052_v9 = vmax.f32 %v769_v3, 0.0 }
 0x15e   : > { %v1314_v0 = vpop.f32.mrf.mxu1 }
 0x15f   : > { %v1315_v1 = vadd.f32 %v2314_v8, %v1314_v0 }
 0x161   : > { %v1624_v4 = vmax.f32 %v1315_v1, 0.0 }
 0x162   : > { %v770_v5 = vpop.f32.mrf.mxu0 }
 0x163   : > { %v771_v6 = vadd.f32 %v2264_v45, %v770_v5  ;;  %v2348_v7 = vpack.c.bf16 %v1624_v4, %v1623_v2 }
 0x165   : > { %v1053_v10 = vmax.f32 %v771_v6, 0.0 }
 0x166   : > { %v1317_v11 = vpop.f32.mrf.mxu1 }
 0x167   : > { %v1168_v14 = vpack.c.bf16 %v1053_v10, %v1052_v9  ;;  %v1318_v17 = vadd.f32 %v2314_v8, %v1317_v11 }
 0x169   : > { %1356 = vmatmul.bf16.gmra.mxu1 %v1168_v14  ;;  %v1625_v21 = vmax.f32 %v1318_v17, 0.0  ;;  %v333_v14 = vld [vmem:[%s2206_s11 + $0x190] sm:$0xff] }
 0x16a   : > { %v773_v16 = vpop.f32.mrf.mxu0 }
 0x16b   : > { %v774_v22 = vadd.f32 %v2264_v45, %v773_v16 }
 0x16d   : > { %2022 = vmatmul.msk.bf16.gmra.mxu0 %vm499_vm2, %v432_v15  ;;  %v1054_v27 = vmax.f32 %v774_v22, 0.0  ;;  %v334_v15 = vld [vmem:[%s2206_s11 + $0x198] sm:$0xff] }
 0x16e   : > { %v1319_v18 = vpop.f32.mrf.mxu1 }
 0x16f   : > { %v1320_v20 = vadd.f32 %v2314_v8, %v1319_v18 }
 0x171   : > { %v1626_v23 = vmax.f32 %v1320_v20, 0.0  ;;  %v436_v20 = vpack.c.bf16 %v334_v15, %v333_v14  ;;  %v339_v14 = vld [vmem:[%s2206_s11 + $0x1c0] sm:$0xff]  ;;  %v340_v15 = vld [vmem:[%s2206_s11 + $0x1c8] sm:$0xff] }
 0x172   : > { %v775_v24 = vpop.f32.mrf.mxu0 }
 0x173   : > { %v776_v25 = vadd.f32 %v2264_v45, %v775_v24  ;;  %v2357_v26 = vpack.c.bf16 %v1626_v23, %v1625_v21 }
 0x175   : > { %v1055_v28 = vmax.f32 %v776_v25, 0.0 }
 0x176   : > { %v1322_v29 = vpop.f32.mrf.mxu1 }
 0x177   : > { %v1169_v32 = vpack.c.bf16 %v1055_v28, %v1054_v27  ;;  %v1323_v24 = vadd.f32 %v2314_v8, %v1322_v29 }
 0x179   : > { %1361 = vmatmul.bf16.gmra.mxu1 %v1169_v32  ;;  %v1627_v31 = vmax.f32 %v1323_v24, 0.0 }
 0x17a   : > { %v778_v34 = vpop.f32.mrf.mxu0 }
 0x17b   : > { %v779_v37 = vadd.f32 %v2264_v45, %v778_v34 }
 0x17d   : > { %2023 = vmatmul.msk.bf16.gmra.mxu0 %vm499_vm2, %v433_v33  ;;  %v1056_v40 = vmax.f32 %v779_v37, 0.0 }
 0x17e   : > { %v1324_v35 = vpop.f32.mrf.mxu1 }
 0x17f   : > { %v1325_v22 = vadd.f32 %v2314_v8, %v1324_v35 }
 0x181   : > { %v1628_v28 = vmax.f32 %v1325_v22, 0.0 }
 0x182   : > { %v780_v38 = vpop.f32.mrf.mxu0 }
 0x183   : > { %v781_v39 = vadd.f32 %v2264_v45, %v780_v38  ;;  %v1751_v29 = vpack.c.bf16 %v1628_v28, %v1627_v31 }
 0x185   : > { %v1057_v41 = vmax.f32 %v781_v39, 0.0 }
 0x186   : > { %v1327_v42 = vpop.f32.mrf.mxu1 }
 0x187   : > { %v1170_v46 = vpack.c.bf16 %v1057_v41, %v1056_v40  ;;  %v1328_v10 = vadd.f32 %v2314_v8, %v1327_v42  ;;  %v335_v42 = vld [vmem:[%s2206_s11 + $0x1a0] sm:$0xff] }
 0x189   : > { %1366 = vmatmul.bf16.gmra.mxu1 %v1170_v46  ;;  %v1629_v18 = vmax.f32 %v1328_v10, 0.0  ;;  %v437_v46 = vpack.c.bf16 %v336_v43, %v335_v42 }
 0x18a   : > { %v783_v48 = vpop.f32.mrf.mxu0 }
 0x18b   : > { %v784_v50 = vadd.f32 %v2264_v45, %v783_v48 }
 0x18d   : > { %2024 = vmatmul.msk.bf16.gmra.mxu0 %vm499_vm2, %v434_v47  ;;  %v1058_v53 = vmax.f32 %v784_v50, 0.0 }
 0x18e   : > { %v1329_v49 = vpop.f32.mrf.mxu1 }
 0x18f   : > { %v1330_v5 = vadd.f32 %v2314_v8, %v1329_v49 }
 0x191   : > { %v1630_v16 = vmax.f32 %v1330_v5, 0.0 }
 0x192   : > { %v785_v51 = vpop.f32.mrf.mxu0 }
 0x193   : > { %v786_v52 = vadd.f32 %v2264_v45, %v785_v51  ;;  %v1752_v23 = vpack.c.bf16 %v1630_v16, %v1629_v18  ;;  %v439_v16 = vpack.c.bf16 %v340_v15, %v339_v14  ;;  %v348_v14 = vld [vmem:[%s2206_s11 + $0x208] sm:$0xff] }
 0x195   : > { %v1059_v55 = vmax.f32 %v786_v52, 0.0 }
 0x196   : > { %v1332_v56 = vpop.f32.mrf.mxu1 }
 0x197   : > { %v1171_v59 = vpack.c.bf16 %v1059_v55, %v1058_v53  ;;  %v1333_v62 = vadd.f32 %v2314_v8, %v1332_v56 }
 0x199   : > { %1371 = vmatmul.bf16.gmra.mxu1 %v1171_v59  ;;  %v1631_v1 = vmax.f32 %v1333_v62, 0.0  ;;  %v338_v62 = vld [vmem:[%s2206_s11 + $0x1b8] sm:$0xff] }
 0x19a   : > { %v788_v61 = vpop.f32.mrf.mxu0 }
 0x19b   : > { %v789_v2 = vadd.f32 %v2264_v45, %v788_v61  ;;  %v337_v61 = vld [vmem:[%s2206_s11 + $0x1b0] sm:$0xff] }
 0x19d   : > { %2025 = vmatmul.msk.bf16.gmra.mxu0 %vm499_vm2, %v435_v60  ;;  %v1060_v11 = vmax.f32 %v789_v2, 0.0 }
 0x19e   : > { %v1334_v63 = vpop.f32.mrf.mxu1 }
 0x19f   : > { %v1335_v0 = vadd.f32 %v2314_v8, %v1334_v63  ;;  %v438_v63 = vpack.c.bf16 %v338_v62, %v337_v61 }
 0x1a1   : > { %v1632_v3 = vmax.f32 %v1335_v0, 0.0 }
 0x1a2   : > { %v790_v4 = vpop.f32.mrf.mxu0 }
 0x1a3   : > { %v791_v6 = vadd.f32 %v2264_v45, %v790_v4  ;;  %v1753_v9 = vpack.c.bf16 %v1632_v3, %v1631_v1 }
 0x1a5   : > { %v1061_v12 = vmax.f32 %v791_v6, 0.0  ;;  %1816 = vmatpush.bf16.xpose.msrb.mxu2 %v1753_v9 }
 0x1a6   : > { %v1337_v13 = vpop.f32.mrf.mxu1 }
 0x1a7   : > { %v1172_v17 = vpack.c.bf16 %v1061_v12, %v1060_v11  ;;  %v1338_v25 = vadd.f32 %v2314_v8, %v1337_v13 }
 0x1a9   : > { %1376 = vmatmul.bf16.gmra.mxu1 %v1172_v17  ;;  %v1633_v32 = vmax.f32 %v1338_v25, 0.0 }
 0x1aa   : > { %v793_v21 = vpop.f32.mrf.mxu0 }
 0x1ab   : > { %v794_v33 = vadd.f32 %v2264_v45, %v793_v21 }
 0x1ad   : > { %2026 = vmatmul.msk.bf16.gmra.mxu0 %vm499_vm2, %v436_v20  ;;  %1817 = vmatpush.bf16.xpose.msrb.mxu2 %v1752_v23  ;;  %v1062_v39 = vmax.f32 %v794_v33, 0.0  ;;  %v342_v33 = vld [vmem:[%s2206_s11 + $0x1d8] sm:$0xff] }
 0x1ae   : > { %v1339_v27 = vpop.f32.mrf.mxu1 }
 0x1af   : > { %v1340_v30 = vadd.f32 %v2314_v8, %v1339_v27 }
 0x1b1   : > { %v1634_v34 = vmax.f32 %v1340_v30, 0.0 }
 0x1b2   : > { %v795_v35 = vpop.f32.mrf.mxu0 }
 0x1b3   : > { %v796_v37 = vadd.f32 %v2264_v45, %v795_v35  ;;  %v2387_v38 = vpack.c.bf16 %v1634_v34, %v1633_v32  ;;  %v341_v32 = vld [vmem:[%s2206_s11 + $0x1d0] sm:$0xff] }
 0x1b5   : > { %v1063_v40 = vmax.f32 %v796_v37, 0.0  ;;  %1818 = vmatpush.bf16.xpose.msrb.mxu2 %v1751_v29 }
 0x1b6   : > { %v1342_v41 = vpop.f32.mrf.mxu1 }
 0x1b7   : > { %v1173_v44 = vpack.c.bf16 %v1063_v40, %v1062_v39  ;;  %v1343_v48 = vadd.f32 %v2314_v8, %v1342_v41 }
 0x1b9   : > { %1381 = vmatmul.bf16.gmra.mxu1 %v1173_v44  ;;  %v1635_v51 = vmax.f32 %v1343_v48, 0.0 }
 0x1ba   : > { %v798_v47 = vpop.f32.mrf.mxu0 }
 0x1bb   : > { %v799_v52 = vadd.f32 %v2264_v45, %v798_v47 }
 0x1bd   : > { %2027 = vmatmul.msk.bf16.gmra.mxu0 %vm499_vm2, %v437_v46  ;;  %1819 = vmatpush.bf16.xpose.msrb.mxu2 %v2357_v26  ;;  %v1064_v58 = vmax.f32 %v799_v52, 0.0 }
 0x1be   : > { %v1344_v49 = vpop.f32.mrf.mxu1 }
 0x1bf   : > { %v1345_v50 = vadd.f32 %v2314_v8, %v1344_v49 }
 0x1c1   : > { %v1636_v53 = vmax.f32 %v1345_v50, 0.0  ;;  %v343_v50 = vld [vmem:[%s2206_s11 + $0x1e0] sm:$0xff] }
 0x1c2   : > { %v800_v55 = vpop.f32.mrf.mxu0 }
 0x1c3   : > { %v801_v56 = vadd.f32 %v2264_v45, %v800_v55  ;;  %v2397_v57 = vpack.c.bf16 %v1636_v53, %v1635_v51  ;;  %v344_v51 = vld [vmem:[%s2206_s11 + $0x1e8] sm:$0xff] }
 0x1c4   : > { %v441_v53 = vpack.c.bf16 %v344_v51, %v343_v50 }
 0x1c5   : > { %v1065_v59 = vmax.f32 %v801_v56, 0.0  ;;  %1820 = vmatpush.bf16.xpose.msrb.mxu2 %v2348_v7 }
 0x1c6   : > { %v1347_v60 = vpop.f32.mrf.mxu1 }
 0x1c7   : > { %v1174_v26 = vpack.c.bf16 %v1065_v59, %v1064_v58  ;;  %v1348_v1 = vadd.f32 %v2314_v8, %v1347_v60 }
 0x1c9   : > { %1386 = vmatmul.bf16.gmra.mxu1 %v1174_v26  ;;  %v1637_v4 = vmax.f32 %v1348_v1, 0.0 }
 0x1ca   : > { %v803_v0 = vpop.f32.mrf.mxu0 }
 0x1cb   : > { %v804_v7 = vadd.f32 %v2264_v45, %v803_v0  ;;  %v346_v0 = vld [vmem:[%s2206_s11 + $0x1f8] sm:$0xff] }
 0x1cd   : > { %2028 = vmatmul.msk.bf16.gmra.mxu0 %vm499_vm2, %v438_v63  ;;  %1821 = vmatpush.bf16.xpose.msrb.mxu2 %v2339_v54  ;;  %v1066_v11 = vmax.f32 %v804_v7, 0.0  ;;  %v345_v63 = vld [vmem:[%s2206_s11 + $0x1f0] sm:$0xff] }
 0x1ce   : > { %v1349_v2 = vpop.f32.mrf.mxu1 }
 0x1cf   : > { %v1350_v3 = vadd.f32 %v2314_v8, %v1349_v2  ;;  %v442_v2 = vpack.c.bf16 %v346_v0, %v345_v63  ;;  %v352_v63 = vld [vmem:[%s2206_s11 + $0x228] sm:$0xff] }
 0x1d1   : > { %v1638_v5 = vmax.f32 %v1350_v3, 0.0 }
 0x1d2   : > { %v805_v6 = vpop.f32.mrf.mxu0 }
 0x1d3   : > { %v806_v9 = vadd.f32 %v2264_v45, %v805_v6  ;;  %v2408_v10 = vpack.c.bf16 %v1638_v5, %v1637_v4 }
 0x1d5   : > { %v1067_v12 = vmax.f32 %v806_v9, 0.0  ;;  %1822 = vmatpush.bf16.xpose.msrb.mxu2 %v2330_v36 }
 0x1d6   : > { %v1352_v13 = vpop.f32.mrf.mxu1 }
 0x1d7   : > { %v1175_v54 = vpack.c.bf16 %v1067_v12, %v1066_v11  ;;  %v1353_v18 = vadd.f32 %v2314_v8, %v1352_v13  ;;  %v347_v13 = vld [vmem:[%s2206_s11 + $0x200] sm:$0xff] }
 0x1d9   : > { %1391 = vmatmul.bf16.gmra.mxu1 %v1175_v54  ;;  %v1639_v22 = vmax.f32 %v1353_v18, 0.0  ;;  %v443_v54 = vpack.c.bf16 %v348_v14, %v347_v13 }
 0x1da   : > { %v808_v17 = vpop.f32.mrf.mxu0 }
 0x1db   : > { %v809_v36 = vadd.f32 %v2264_v45, %v808_v17 }
 0x1dd   : > { %2029 = vmatmul.msk.bf16.gmra.mxu0 %vm499_vm2, %v439_v16  ;;  %1823 = vmatpush.bf16.xpose.msrb.mxu2 %v2321_v19  ;;  %v1068_v28 = vmax.f32 %v809_v36, 0.0  ;;  %v440_v19 = vpack.c.bf16 %v342_v33, %v341_v32 }
 0x1de   : > { %v1354_v20 = vpop.f32.mrf.mxu1 }
 0x1df   : > { %v1355_v21 = vadd.f32 %v2314_v8, %v1354_v20 }
 0x1e1   : > { %v1640_v23 = vmax.f32 %v1355_v21, 0.0 }
 0x1e2   : > { %v810_v24 = vpop.f32.mrf.mxu0 }
 0x1e3   : > { %v811_v25 = vadd.f32 %v2264_v45, %v810_v24  ;;  %v2419_v27 = vpack.c.bf16 %v1640_v23, %v1639_v22 }
 0x1e5   : > { %v1069_v30 = vmax.f32 %v811_v25, 0.0 }
 0x1e6   : > { %v1357_v31 = vpop.f32.mrf.mxu1 }
 0x1e7   : > { %v1176_v34 = vpack.c.bf16 %v1069_v30, %v1068_v28  ;;  %v1358_v37 = vadd.f32 %v2314_v8, %v1357_v31 }
 0x1e9   : > { %1396 = vmatmul.bf16.gmra.mxu1 %v1176_v34  ;;  %v1641_v40 = vmax.f32 %v1358_v37, 0.0  ;;  %v349_v34 = vld [vmem:[%s2206_s11 + $0x210] sm:$0xff] }
 0x1ea   : > { %v813_v35 = vpop.f32.mrf.mxu0 }
 0x1eb   : > { %v814_v41 = vadd.f32 %v2264_v45, %v813_v35 }
 0x1ed   : > { %2030 = vmatmul.msk.bf16.gmra.mxu0 %vm499_vm2, %v440_v19  ;;  %v1070_v47 = vmax.f32 %v814_v41, 0.0  ;;  %v350_v19 = vld [vmem:[%s2206_s11 + $0x218] sm:$0xff] }
 0x1ee   : > { %v1359_v29 = vpop.f32.mrf.mxu1 }
 0x1ef   : > { %v1360_v39 = vadd.f32 %v2314_v8, %v1359_v29 }
 0x1f1   : > { %v1642_v42 = vmax.f32 %v1360_v39, 0.0  ;;  %v444_v39 = vpack.c.bf16 %v350_v19, %v349_v34  ;;  %v355_v34 = vld [vmem:[%s2206_s11 + $0x240] sm:$0xff]  ;;  %v356_v19 = vld [vmem:[%s2206_s11 + $0x248] sm:$0xff] }
 0x1f2   : > { %v815_v43 = vpop.f32.mrf.mxu0 }
 0x1f3   : > { %v816_v44 = vadd.f32 %v2264_v45, %v815_v43  ;;  %v2428_v46 = vpack.c.bf16 %v1642_v42, %v1641_v40 }
 0x1f5   : > { %v1071_v48 = vmax.f32 %v816_v44, 0.0 }
 0x1f6   : > { %v1362_v49 = vpop.f32.mrf.mxu1 }
 0x1f7   : > { %v1177_v52 = vpack.c.bf16 %v1071_v48, %v1070_v47  ;;  %v1363_v43 = vadd.f32 %v2314_v8, %v1362_v49 }
 0x1f9   : > { %1401 = vmatmul.bf16.gmra.mxu1 %v1177_v52  ;;  %v1643_v51 = vmax.f32 %v1363_v43, 0.0 }
 0x1fa   : > { %v818_v55 = vpop.f32.mrf.mxu0 }
 0x1fb   : > { %v819_v58 = vadd.f32 %v2264_v45, %v818_v55 }
 0x1fd   : > { %2031 = vmatmul.msk.bf16.gmra.mxu0 %vm499_vm2, %v441_v53  ;;  %v1072_v61 = vmax.f32 %v819_v58, 0.0 }
 0x1fe   : > { %v1364_v56 = vpop.f32.mrf.mxu1 }
 0x1ff   : > { %v1365_v41 = vadd.f32 %v2314_v8, %v1364_v56 }
 0x201   : > { %v1644_v48 = vmax.f32 %v1365_v41, 0.0 }
 0x202   : > { %v820_v59 = vpop.f32.mrf.mxu0 }
 0x203   : > { %v821_v60 = vadd.f32 %v2264_v45, %v820_v59  ;;  %v1759_v49 = vpack.c.bf16 %v1644_v48, %v1643_v51 }
 0x205   : > { %v1073_v62 = vmax.f32 %v821_v60, 0.0 }
 0x206   : > { %v1367_v26 = vpop.f32.mrf.mxu1 }
 0x207   : > { %v1178_v1 = vpack.c.bf16 %v1073_v62, %v1072_v61  ;;  %v1368_v30 = vadd.f32 %v2314_v8, %v1367_v26  ;;  %v351_v26 = vld [vmem:[%s2206_s11 + $0x220] sm:$0xff] }
 0x209   : > { %1406 = vmatmul.bf16.gmra.mxu1 %v1178_v1  ;;  %v1645_v29 = vmax.f32 %v1368_v30, 0.0  ;;  %v445_v1 = vpack.c.bf16 %v352_v63, %v351_v26  ;;  %v2503_v63 = vld [vmem:[%s2883_s2] ss:$0 sm:$0xff] }
 0x20a   : > { %v823_v3 = vpop.f32.mrf.mxu0 }
 0x20b   : > { %v824_v7 = vadd.f32 %v2264_v45, %v823_v3 }
 0x20d   : > { %2032 = vmatmul.msk.bf16.gmra.mxu0 %vm499_vm2, %v442_v2  ;;  %v1074_v9 = vmax.f32 %v824_v7, 0.0 }
 0x20e   : > { %v1369_v4 = vpop.f32.mrf.mxu1 }
 0x20f   : > { %v1370_v24 = vadd.f32 %v2314_v8, %v1369_v4 }
 0x211   : > { %v1646_v35 = vmax.f32 %v1370_v24, 0.0 }
 0x212   : > { %v825_v5 = vpop.f32.mrf.mxu0 }
 0x213   : > { %v826_v6 = vadd.f32 %v2264_v45, %v825_v5  ;;  %v1760_v42 = vpack.c.bf16 %v1646_v35, %v1645_v29  ;;  %v447_v35 = vpack.c.bf16 %v356_v19, %v355_v34 }
 0x215   : > { %v1075_v11 = vmax.f32 %v826_v6, 0.0 }
 0x216   : > { %v1372_v12 = vpop.f32.mrf.mxu1 }
 0x217   : > { %v1179_v15 = vpack.c.bf16 %v1075_v11, %v1074_v9  ;;  %v1373_v17 = vadd.f32 %v2314_v8, %v1372_v12 }
 0x219   : > { %1411 = vmatmul.bf16.gmra.mxu1 %v1179_v15  ;;  %v1647_v21 = vmax.f32 %v1373_v17, 0.0  ;;  %v354_v17 = vld [vmem:[%s2206_s11 + $0x238] sm:$0xff] }
 0x21a   : > { %v828_v16 = vpop.f32.mrf.mxu0 }
 0x21b   : > { %v829_v22 = vadd.f32 %v2264_v45, %v828_v16  ;;  %v353_v16 = vld [vmem:[%s2206_s11 + $0x230] sm:$0xff] }
 0x21d   : > { %2033 = vmatmul.msk.bf16.gmra.mxu0 %vm499_vm2, %v443_v54  ;;  %v1076_v31 = vmax.f32 %v829_v22, 0.0 }
 0x21e   : > { %v1374_v18 = vpop.f32.mrf.mxu1 }
 0x21f   : > { %v1375_v20 = vadd.f32 %v2314_v8, %v1374_v18  ;;  %v446_v18 = vpack.c.bf16 %v354_v17, %v353_v16  ;;  %v366_v16 = vld [vmem:[%s2206_s11 + $0x298] sm:$0xff] }
 0x221   : > { %v1648_v36 = vmax.f32 %v1375_v20, 0.0 }
 0x222   : > { %v830_v23 = vpop.f32.mrf.mxu0 }
 0x223   : > { %v831_v25 = vadd.f32 %v2264_v45, %v830_v23  ;;  %v1761_v28 = vpack.c.bf16 %v1648_v36, %v1647_v21 }
 0x225   : > { %v1077_v32 = vmax.f32 %v831_v25, 0.0  ;;  %1829 = vmatpush.bf16.xpose.msrb.mxu3 %v1761_v28 }
 0x226   : > { %v1377_v33 = vpop.f32.mrf.mxu1 }
 0x227   : > { %v1180_v37 = vpack.c.bf16 %v1077_v32, %v1076_v31  ;;  %v1378_v44 = vadd.f32 %v2314_v8, %v1377_v33 }
 0x229   : > { %1416 = vmatmul.bf16.gmra.mxu1 %v1180_v37  ;;  %v1649_v52 = vmax.f32 %v1378_v44, 0.0 }
 0x22a   : > { %v833_v40 = vpop.f32.mrf.mxu0 }
 0x22b   : > { %v834_v53 = vadd.f32 %v2264_v45, %v833_v40 }
 0x22d   : > { %2034 = vmatmul.msk.bf16.gmra.mxu0 %vm499_vm2, %v444_v39  ;;  %1830 = vmatpush.bf16.xpose.msrb.mxu3 %v1760_v42  ;;  %v1078_v60 = vmax.f32 %v834_v53, 0.0  ;;  %v358_v53 = vld [vmem:[%s2206_s11 + $0x258] sm:$0xff] }
 0x22e   : > { %v1379_v47 = vpop.f32.mrf.mxu1 }
 0x22f   : > { %v1380_v50 = vadd.f32 %v2314_v8, %v1379_v47 }
 0x231   : > { %v1650_v55 = vmax.f32 %v1380_v50, 0.0 }
 0x232   : > { %v835_v56 = vpop.f32.mrf.mxu0 }
 0x233   : > { %v836_v58 = vadd.f32 %v2264_v45, %v835_v56  ;;  %v2458_v59 = vpack.c.bf16 %v1650_v55, %v1649_v52  ;;  %v357_v52 = vld [vmem:[%s2206_s11 + $0x250] sm:$0xff] }
 0x234   : > { %v448_v55 = vpack.c.bf16 %v358_v53, %v357_v52 }
 0x235   : > { %v1079_v61 = vmax.f32 %v836_v58, 0.0  ;;  %1831 = vmatpush.bf16.xpose.msrb.mxu3 %v1759_v49  ;;  %v363_v58 = vld [vmem:[%s2206_s11 + $0x280] sm:$0xff]  ;;  %v364_v49 = vld [vmem:[%s2206_s11 + $0x288] sm:$0xff] }
 0x236   : > { %v1382_v62 = vpop.f32.mrf.mxu1 }
 0x237   : > { %v1181_v0 = vpack.c.bf16 %v1079_v61, %v1078_v60  ;;  %v1383_v3 = vadd.f32 %v2314_v8, %v1382_v62 }
 0x239   : > { %1421 = vmatmul.bf16.gmra.mxu1 %v1181_v0  ;;  %v1651_v5 = vmax.f32 %v1383_v3, 0.0 }
 0x23a   : > { %v838_v2 = vpop.f32.mrf.mxu0 }
 0x23b   : > { %v839_v6 = vadd.f32 %v2264_v45, %v838_v2 }
 0x23d   : > { %2035 = vmatmul.msk.bf16.gmra.mxu0 %vm499_vm2, %v445_v1  ;;  %1832 = vmatpush.bf16.xpose.msrb.mxu3 %v2428_v46  ;;  %v1080_v14 = vmax.f32 %v839_v6, 0.0 }
 0x23e   : > { %v1384_v4 = vpop.f32.mrf.mxu1 }
 0x23f   : > { %v1385_v7 = vadd.f32 %v2314_v8, %v1384_v4 }
 0x241   : > { %v1652_v9 = vmax.f32 %v1385_v7, 0.0 }
 0x242   : > { %v840_v11 = vpop.f32.mrf.mxu0 }
 0x243   : > { %v841_v12 = vadd.f32 %v2264_v45, %v840_v11  ;;  %v2468_v13 = vpack.c.bf16 %v1652_v9, %v1651_v5  ;;  %v359_v9 = vld [vmem:[%s2206_s11 + $0x260] sm:$0xff]  ;;  %v360_v11 = vld [vmem:[%s2206_s11 + $0x268] sm:$0xff] }
 0x245   : > { %v1081_v15 = vmax.f32 %v841_v12, 0.0  ;;  %1833 = vmatpush.bf16.xpose.msrb.mxu3 %v2419_v27 }
 0x246   : > { %v1387_v54 = vpop.f32.mrf.mxu1 }
 0x247   : > { %v1182_v46 = vpack.c.bf16 %v1081_v15, %v1080_v14  ;;  %v1388_v21 = vadd.f32 %v2314_v8, %v1387_v54  ;;  %v449_v14 = vpack.c.bf16 %v360_v11, %v359_v9  ;;  %v365_v54 = vld [vmem:[%s2206_s11 + $0x290] sm:$0xff] }
 0x249   : > { %1426 = vmatmul.bf16.gmra.mxu1 %v1182_v46  ;;  %v1653_v23 = vmax.f32 %v1388_v21, 0.0  ;;  %v452_v46 = vpack.c.bf16 %v366_v16, %v365_v54 }
 0x24a   : > { %v843_v20 = vpop.f32.mrf.mxu0 }
 0x24b   : > { %v844_v27 = vadd.f32 %v2264_v45, %v843_v20 }
 0x24d   : > { %2036 = vmatmul.msk.bf16.gmra.mxu0 %vm499_vm2, %v446_v18  ;;  %1834 = vmatpush.bf16.xpose.msrb.mxu3 %v2408_v10  ;;  %v1082_v31 = vmax.f32 %v844_v27, 0.0 }
 0x24e   : > { %v1389_v22 = vpop.f32.mrf.mxu1 }
 0x24f   : > { %v1390_v36 = vadd.f32 %v2314_v8, %v1389_v22 }
 0x251   : > { %v1654_v24 = vmax.f32 %v1390_v36, 0.0 }
 0x252   : > { %v845_v25 = vpop.f32.mrf.mxu0 }
 0x253   : > { %v846_v28 = vadd.f32 %v2264_v45, %v845_v25  ;;  %v2479_v30 = vpack.c.bf16 %v1654_v24, %v1653_v23 }
 0x255   : > { %v1083_v32 = vmax.f32 %v846_v28, 0.0  ;;  %1835 = vmatpush.bf16.xpose.msrb.mxu3 %v2397_v57 }
 0x256   : > { %v1392_v33 = vpop.f32.mrf.mxu1 }
 0x257   : > { %v1183_v10 = vpack.c.bf16 %v1083_v32, %v1082_v31  ;;  %v1393_v29 = vadd.f32 %v2314_v8, %v1392_v33  ;;  %v361_v32 = vld [vmem:[%s2206_s11 + $0x270] sm:$0xff]  ;;  %v362_v33 = vld [vmem:[%s2206_s11 + $0x278] sm:$0xff] }
 0x258   : > { %v450_v19 = vpack.c.bf16 %v362_v33, %v361_v32  ;;  %v373_v32 = vld [vmem:[%s2206_s11 + $0x2d0] sm:$0xff]  ;;  %v374_v33 = vld [vmem:[%s2206_s11 + $0x2d8] sm:$0xff] }
 0x259   : > { %1431 = vmatmul.bf16.gmra.mxu1 %v1183_v10  ;;  %v1655_v57 = vmax.f32 %v1393_v29, 0.0 }
 0x25a   : > { %v848_v37 = vpop.f32.mrf.mxu0 }
 0x25b   : > { %v849_v41 = vadd.f32 %v2264_v45, %v848_v37  ;;  %v368_v37 = vld [vmem:[%s2206_s11 + $0x2a8] sm:$0xff] }
 0x25d   : > { %2037 = vmatmul.msk.bf16.gmra.mxu0 %vm499_vm2, %v447_v35  ;;  %1836 = vmatpush.bf16.xpose.msrb.mxu3 %v2387_v38  ;;  %v1084_v48 = vmax.f32 %v849_v41, 0.0  ;;  %v367_v35 = vld [vmem:[%s2206_s11 + $0x2a0] sm:$0xff] }
 0x25e   : > { %v1394_v39 = vpop.f32.mrf.mxu1 }
 0x25f   : > { %v1395_v40 = vadd.f32 %v2314_v8, %v1394_v39  ;;  %v453_v39 = vpack.c.bf16 %v368_v37, %v367_v35 }
 0x261   : > { %v1656_v42 = vmax.f32 %v1395_v40, 0.0 }
 0x262   : > { %v850_v43 = vpop.f32.mrf.mxu0 }
 0x263   : > { %v851_v44 = vadd.f32 %v2264_v45, %v850_v43  ;;  %v2490_v47 = vpack.c.bf16 %v1656_v42, %v1655_v57  ;;  %v451_v45 = vpack.c.bf16 %v364_v49, %v363_v58  ;;  %v370_v58 = vld [vmem:[%s2206_s11 + $0x2b8] sm:$0xff] }
 0x265   : > { %v1085_v50 = vmax.f32 %v851_v44, 0.0  ;;  %2041 = vmatmul.msk.bf16.vlgmr.msra.gmra.mxu3 %vm499_vm2, %v451_v45 }
 0x266   : > { %v1397_v51 = vpop.f32.mrf.mxu1 }
 0x267   : > { %v1184_v38 = vpack.c.bf16 %v1085_v50, %v1084_v48  ;;  %v1398_v60 = vadd.f32 %v2314_v8, %v1397_v51 }
 0x269   : > { %1436 = vmatmul.bf16.gmra.mxu1 %v1184_v38  ;;  %v1657_v26 = vmax.f32 %v1398_v60, 0.0 }
 0x26a   : > { %v853_v56 = vpop.f32.mrf.mxu0 }
 0x26b   : > { %v854_v0 = vadd.f32 %v2503_v63, %v853_v56  ;;  %v369_v56 = vld [vmem:[%s2206_s11 + $0x2b0] sm:$0xff] }
 0x26c   : > { %v454_v60 = vpack.c.bf16 %v370_v58, %v369_v56 }
 0x26d   : > { %2038 = vmatmul.msk.bf16.gmra.mxu0 %vm499_vm2, %v448_v55  ;;  %v1086_v7 = vmax.f32 %v854_v0, 0.0 }
 0x26e   : > { %v1399_v61 = vpop.f32.mrf.mxu1 }
 0x26f   : > { %v1400_v62 = vadd.f32 %v2314_v8, %v1399_v61 }
 0x271   : > { %v1658_v1 = vmax.f32 %v1400_v62, 0.0 }
 0x272   : > { %v855_v2 = vpop.f32.mrf.mxu0 }
 0x273   : > { %v856_v3 = vadd.f32 %v2503_v63, %v855_v2  ;;  %v2507_v4 = vpack.c.bf16 %v1658_v1, %v1657_v26 }
 0x275   : > { %v1087_v5 = vmax.f32 %v856_v3, 0.0  ;;  %2042 = vmatmul.msk.bf16.gmra.mxu3 %vm499_vm2, %v452_v46 }
 0x276   : > { %v1402_v6 = vpop.f32.mrf.mxu1 }
 0x277   : > { %v1185_v12 = vpack.c.bf16 %v1087_v5, %v1086_v7  ;;  %v1403_v17 = vadd.f32 %v2314_v8, %v1402_v6 }
 0x279   : > { %1441 = vmatmul.bf16.gmra.mxu1 %v1185_v12  ;;  %v1659_v21 = vmax.f32 %v1403_v17, 0.0  ;;  %v371_v12 = vld [vmem:[%s2206_s11 + $0x2c0] sm:$0xff] }
 0x27a   : > { %v858_v15 = vpop.f32.mrf.mxu0 }
 0x27b   : > { %v859_v22 = vadd.f32 %v2503_v63, %v858_v15 }
 0x27d   : > { %2039 = vmatmul.msk.bf16.gmra.mxu0 %vm499_vm2, %v449_v14  ;;  %v1088_v25 = vmax.f32 %v859_v22, 0.0  ;;  %v372_v14 = vld [vmem:[%s2206_s11 + $0x2c8] sm:$0xff] }
 0x27e   : > { %v1404_v18 = vpop.f32.mrf.mxu1  ;;  %v455_v54 = vpack.c.bf16 %v372_v14, %v371_v12 }
 0x27f   : > { %v1405_v20 = vadd.f32 %v2314_v8, %v1404_v18 }
 0x281   : > { %v1660_v36 = vmax.f32 %v1405_v20, 0.0 }
 0x282   : > { %v860_v23 = vpop.f32.mrf.mxu0 }
 0x283   : > { %v861_v27 = vadd.f32 %v2503_v63, %v860_v23  ;;  %v2519_v24 = vpack.c.bf16 %v1660_v36, %v1659_v21 }
 0x285   : > { %v1089_v28 = vmax.f32 %v861_v27, 0.0  ;;  %2043 = vmatmul.msk.bf16.gmra.mxu3 %vm499_vm2, %v453_v39 }
 0x286   : > { %v1407_v31 = vpop.f32.mrf.mxu1 }
 0x287   : > { %v1186_v34 = vpack.c.bf16 %v1089_v28, %v1088_v25  ;;  %v1408_v29 = vadd.f32 %v2314_v8, %v1407_v31 }
 0x289   : > { %1446 = vmatmul.bf16.gmra.mxu1 %v1186_v34  ;;  %v1661_v41 = vmax.f32 %v1408_v29, 0.0 }
 0x28a   : > { %v863_v10 = vpop.f32.mrf.mxu0 }
 0x28b   : > { %v864_v42 = vadd.f32 %v2503_v63, %v863_v10 }
 0x28d   : > { %2040 = vmatmul.msk.bf16.gmra.mxu0 %vm499_vm2, %v450_v19  ;;  %v1090_v51 = vmax.f32 %v864_v42, 0.0  ;;  %v456_v19 = vpack.c.bf16 %v374_v33, %v373_v32 }
 0x28e   : > { %v1409_v40 = vpop.f32.mrf.mxu1 }
 0x28f   : > { %v1410_v57 = vadd.f32 %v2314_v8, %v1409_v40 }
 0x291   : > { %v1662_v43 = vmax.f32 %v1410_v57, 0.0 }
 0x292   : > { %v865_v44 = vpop.f32.mrf.mxu0 }
 0x293   : > { %v866_v48 = vadd.f32 %v2503_v63, %v865_v44  ;;  %v2531_v50 = vpack.c.bf16 %v1662_v43, %v1661_v41 }
 0x295   : > { %v1091_v52 = vmax.f32 %v866_v48, 0.0  ;;  %2044 = vmatmul.msk.bf16.gmra.mxu3 %vm499_vm2, %v454_v60 }
 0x296   : > { %v1412_v53 = vpop.f32.mrf.mxu1 }
 0x297   : > { %v1187_v38 = vpack.c.bf16 %v1091_v52, %v1090_v51  ;;  %v1413_v49 = vadd.f32 %v2314_v8, %v1412_v53  ;;  %v375_v52 = vld [vmem:[%s2206_s11 + $0x2e0] sm:$0xff]  ;;  %v376_v53 = vld [vmem:[%s2206_s11 + $0x2e8] sm:$0xff] }
 0x299   : > { %1451 = vmatmul.bf16.gmra.mxu1 %v1187_v38  ;;  %v1663_v62 = vmax.f32 %v1413_v49, 0.0 }
 0x29a   : > { %v868_v55 = vpop.f32.mrf.mxu0 }
 0x29b   : > { %v869_v26 = vadd.f32 %v2503_v63, %v868_v55  ;;  %v457_v55 = vpack.c.bf16 %v376_v53, %v375_v52  ;;  %v381_v53 = vld [vmem:[%s2206_s11 + $0x310] sm:$0xff] }
 0x29d   : > { %v1092_v7 = vmax.f32 %v869_v26, 0.0 }
 0x29e   : > { %v1414_v45 = vpop.f32.mrf.mxu1 }
 0x29f   : > { %v1415_v61 = vadd.f32 %v2314_v8, %v1414_v45 }
 0x2a1   : > { %v1664_v0 = vmax.f32 %v1415_v61, 0.0 }
 0x2a2   : > { %v870_v1 = vpop.f32.mrf.mxu0 }
 0x2a3   : > { %v2539_v2 = vpack.c.bf16 %v1664_v0, %v1663_v62  ;;  %v871_v3 = vadd.f32 %v2503_v63, %v870_v1 }
 0x2a5   : > { %v1093_v5 = vmax.f32 %v871_v3, 0.0  ;;  %2045 = vmatmul.msk.bf16.gmra.mxu3 %vm499_vm2, %v455_v54 }
 0x2a6   : > { %v1417_v6 = vpop.f32.mrf.mxu1 }
 0x2a7   : > { %v1188_v9 = vpack.c.bf16 %v1093_v5, %v1092_v7  ;;  %v1418_v15 = vadd.f32 %v2314_v8, %v1417_v6  ;;  %v377_v6 = vld [vmem:[%s2206_s11 + $0x2f0] sm:$0xff] }
 0x2a9   : > { %1456 = vmatmul.bf16.gmra.mxu1 %v1188_v9  ;;  %v1665_v46 = vmax.f32 %v1418_v15, 0.0  ;;  %v378_v9 = vld [vmem:[%s2206_s11 + $0x2f8] sm:$0xff] }
 0x2aa   : > { %v873_v11 = vpop.f32.mrf.mxu0  ;;  %v458_v12 = vpack.c.bf16 %v378_v9, %v377_v6  ;;  %v384_v6 = vld [vmem:[%s2206_s11 + $0x328] sm:$0xff] }
 0x2ab   : > { %v874_v18 = vadd.f32 %v2503_v63, %v873_v11 }
 0x2ad   : > { %v1094_v23 = vmax.f32 %v874_v18, 0.0 }
 0x2ae   : > { %v1419_v16 = vpop.f32.mrf.mxu1 }
 0x2af   : > { %v1420_v17 = vadd.f32 %v2314_v8, %v1419_v16 }
 0x2b1   : > { %v1666_v20 = vmax.f32 %v1420_v17, 0.0 }
 0x2b2   : > { %v875_v21 = vpop.f32.mrf.mxu0 }
 0x2b3   : > { %v876_v22 = vadd.f32 %v2503_v63, %v875_v21  ;;  %v2549_v36 = vpack.c.bf16 %v1666_v20, %v1665_v46 }
 0x2b5   : > { %v1095_v27 = vmax.f32 %v876_v22, 0.0  ;;  %2046 = vmatmul.msk.bf16.gmra.mxu3 %vm499_vm2, %v456_v19 }
 0x2b6   : > { %v1422_v25 = vpop.f32.mrf.mxu1 }
 0x2b7   : > { %v1189_v28 = vpack.c.bf16 %v1095_v27, %v1094_v23  ;;  %v1423_v34 = vadd.f32 %v2314_v8, %v1422_v25 }
 0x2b9   : > { %1461 = vmatmul.bf16.gmra.mxu1 %v1189_v28  ;;  %v1667_v37 = vmax.f32 %v1423_v34, 0.0  ;;  %v379_v28 = vld [vmem:[%s2206_s11 + $0x300] sm:$0xff] }
 0x2ba   : > { %v878_v31 = vpop.f32.mrf.mxu0 }
 0x2bb   : > { %v879_v29 = vadd.f32 %v2503_v63, %v878_v31  ;;  %v380_v31 = vld [vmem:[%s2206_s11 + $0x308] sm:$0xff] }
 0x2bc   : > { %v459_v33 = vpack.c.bf16 %v380_v31, %v379_v28 }
 0x2bd   : > { %v1096_v42 = vmax.f32 %v879_v29, 0.0 }
 0x2be   : > { %v1424_v10 = vpop.f32.mrf.mxu1 }
 0x2bf   : > { %v1425_v35 = vadd.f32 %v2314_v8, %v1424_v10  ;;  %v2565_v8 = vld [vmem:[%s2885_s4] ss:$0 sm:$0xff] }
 0x2c1   : > { %v1668_v39 = vmax.f32 %v1425_v35, 0.0 }
 0x2c2   : > { %v880_v40 = vpop.f32.mrf.mxu0 }
 0x2c3   : > { %v881_v57 = vadd.f32 %v2503_v63, %v880_v40  ;;  %v2558_v41 = vpack.c.bf16 %v1668_v39, %v1667_v37 }
 0x2c5   : > { %v1097_v43 = vmax.f32 %v881_v57, 0.0  ;;  %2047 = vmatmul.msk.bf16.gmra.mxu3 %vm499_vm2, %v457_v55 }
 0x2c6   : > { %v1427_v44 = vpop.f32.mrf.mxu1 }
 0x2c7   : > { %v1190_v48 = vpack.c.bf16 %v1097_v43, %v1096_v42  ;;  %v1428_v38 = vadd.f32 %v2565_v8, %v1427_v44 }
 0x2c9   : > { %1466 = vmatmul.bf16.gmra.mxu1 %v1190_v48  ;;  %v1669_v49 = vmax.f32 %v1428_v38, 0.0  ;;  %v382_v38 = vld [vmem:[%s2206_s11 + $0x318] sm:$0xff] }
 0x2ca   : > { %v883_v51 = vpop.f32.mrf.mxu0 }
 0x2cb   : > { %v884_v60 = vadd.f32 %v2503_v63, %v883_v51 }
 0x2cd   : > { %v1098_v0 = vmax.f32 %v884_v60, 0.0 }
 0x2ce   : > { %v1429_v56 = vpop.f32.mrf.mxu1 }
 0x2cf   : > { %v1430_v58 = vadd.f32 %v2565_v8, %v1429_v56  ;;  %v460_v56 = vpack.c.bf16 %v382_v38, %v381_v53 }
 0x2d1   : > { %v1670_v45 = vmax.f32 %v1430_v58, 0.0 }
 0x2d2   : > { %v885_v61 = vpop.f32.mrf.mxu0 }
 0x2d3   : > { %v886_v62 = vadd.f32 %v2503_v63, %v885_v61  ;;  %v2572_v26 = vpack.c.bf16 %v1670_v45, %v1669_v49 }
 0x2d5   : > { %v1099_v1 = vmax.f32 %v886_v62, 0.0  ;;  %2048 = vmatmul.msk.bf16.gmra.mxu3 %vm499_vm2, %v458_v12 }
 0x2d6   : > { %v1432_v3 = vpop.f32.mrf.mxu1 }
 0x2d7   : > { %v1191_v7 = vpack.c.bf16 %v1099_v1, %v1098_v0  ;;  %v1433_v11 = vadd.f32 %v2565_v8, %v1432_v3 }
 0x2d9   : > { %1471 = vmatmul.bf16.gmra.mxu1 %v1191_v7  ;;  %v1671_v54 = vmax.f32 %v1433_v11, 0.0 }
 0x2da   : > { %v888_v5 = vpop.f32.mrf.mxu0 }
 0x2db   : > { %v889_v16 = vadd.f32 %v2503_v63, %v888_v5  ;;  %v383_v5 = vld [vmem:[%s2206_s11 + $0x320] sm:$0xff] }
 0x2dc   : > { %v461_v11 = vpack.c.bf16 %v384_v6, %v383_v5 }
 0x2dd   : > { %v1100_v21 = vmax.f32 %v889_v16, 0.0 }
 0x2de   : > { %v1434_v14 = vpop.f32.mrf.mxu1 }
 0x2df   : > { %v1435_v15 = vadd.f32 %v2565_v8, %v1434_v14 }
 0x2e1   : > { %v1672_v17 = vmax.f32 %v1435_v15, 0.0 }
 0x2e2   : > { %v890_v46 = vpop.f32.mrf.mxu0 }
 0x2e3   : > { %v2580_v18 = vpack.c.bf16 %v1672_v17, %v1671_v54  ;;  %v891_v20 = vadd.f32 %v2503_v63, %v890_v46 }
 0x2e5   : > { %v1101_v22 = vmax.f32 %v891_v20, 0.0  ;;  %2049 = vmatmul.msk.bf16.gmra.mxu3 %vm499_vm2, %v459_v33 }
 0x2e6   : > { %v1437_v23 = vpop.f32.mrf.mxu1 }
 0x2e7   : > { %v1192_v27 = vpack.c.bf16 %v1101_v22, %v1100_v21  ;;  %v1438_v32 = vadd.f32 %v2565_v8, %v1437_v23  ;;  %v385_v23 = vld [vmem:[%s2206_s11 + $0x330] sm:$0xff] }
 0x2e8   : > { %v908_v39 = vpop.f32.mrf.mxu3 }
 0x2e9   : > { %1476 = vmatmul.bf16.gmra.mxu1 %v1192_v27  ;;  %v1673_v10 = vmax.f32 %v1438_v32, 0.0  ;;  %v386_v27 = vld [vmem:[%s2206_s11 + $0x338] sm:$0xff]  ;;  %v909_v31 = vadd.f32 %v2503_v63, %v908_v39 }
 0x2ea   : > { %v893_v25 = vpop.f32.mrf.mxu0  ;;  %v462_v28 = vpack.c.bf16 %v386_v27, %v385_v23 }
 0x2eb   : > { %v894_v35 = vadd.f32 %v2503_v63, %v893_v25 }
 0x2ed   : > { %v1102_v42 = vmax.f32 %v894_v35, 0.0 }
 0x2ee   : > { %v1439_v34 = vpop.f32.mrf.mxu1 }
 0x2ef   : > { %v1440_v19 = vadd.f32 %v2565_v8, %v1439_v34 }
 0x2f0   : > { %v910_v52 = vpop.f32.mrf.mxu3 }
 0x2f1   : > { %v1674_v37 = vmax.f32 %v1440_v19, 0.0  ;;  %v911_v32 = vadd.f32 %v2503_v63, %v910_v52 }
 0x2f2   : > { %v895_v29 = vpop.f32.mrf.mxu0 }
 0x2f3   : > { %v2589_v40 = vpack.c.bf16 %v1674_v37, %v1673_v10  ;;  %v896_v57 = vadd.f32 %v2503_v63, %v895_v29  ;;  %v1108_v10 = vmax.f32 %v909_v31, 0.0  ;;  %v1109_v35 = vmax.f32 %v911_v32, 0.0 }
 0x2f5   : > { %v1103_v43 = vmax.f32 %v896_v57, 0.0  ;;  %2050 = vmatmul.msk.bf16.gmra.mxu3 %vm499_vm2, %v460_v56  ;;  %v387_v56 = vld [vmem:[%s2206_s11 + $0x340] sm:$0xff] }
 0x2f6   : > { %v2592_v44 = vpop.f32.mrf.mxu1 }
 0x2f7   : > { %v1193_v48 = vpack.c.bf16 %v1103_v43, %v1102_v42  ;;  %v1196_v43 = vpack.c.bf16 %v1109_v35, %v1108_v10  ;;  %v1443_v53 = vadd.f32 %v2565_v8, %v2592_v44 }
 0x2f8   : > { %v913_v45 = vpop.f32.mrf.mxu3 }
 0x2f9   : > { %1481 = vmatmul.bf16.gmra.mxu1 %v1193_v48 }
 0x2fa   : > { %v898_v51 = vpop.f32.mrf.mxu0 }
 0x2fb   : > { %v899_v58 = vadd.f32 %v2503_v63, %v898_v51 }
 0x2fd   : > { %v1104_v61 = vmax.f32 %v899_v58, 0.0  ;;  %v388_v58 = vld [vmem:[%s2206_s11 + $0x348] sm:$0xff] }
 0x2fe   : > { %v1444_v55 = vpop.f32.mrf.mxu1 }
 0x300   : > { %v915_v7 = vpop.f32.mrf.mxu3 }
 0x302   : > { %v900_v49 = vpop.f32.mrf.mxu0 }
 0x303   : > { %v901_v60 = vadd.f32 %v2503_v63, %v900_v49 }
 0x305   : > { %v1105_v62 = vmax.f32 %v901_v60, 0.0  ;;  %2051 = vmatmul.msk.bf16.gmra.mxu3 %vm499_vm2, %v461_v11  ;;  %v463_v60 = vpack.c.bf16 %v388_v58, %v387_v56 }
 0x306   : > { %v1447_v0 = vpop.f32.mrf.mxu1 }
 0x307   : > { %v1194_v1 = vpack.c.bf16 %v1105_v62, %v1104_v61  ;;  %v1448_v39 = vadd.f32 %v2565_v8, %v1447_v0  ;;  %v914_v62 = vadd.f32 %v2503_v63, %v913_v45  ;;  %v916_v0 = vadd.f32 %v2503_v63, %v915_v7 }
 0x308   : > { %v2604_v54 = vpop.f32.mrf.mxu3 }
 0x309   : > { %1486 = vmatmul.bf16.gmra.mxu1 %v1194_v1  ;;  %v1677_v48 = vmax.f32 %v1448_v39, 0.0  ;;  %v1110_v5 = vmax.f32 %v914_v62, 0.0  ;;  %v1111_v6 = vmax.f32 %v916_v0, 0.0 }
 0x30a   : > { %v903_v3 = vpop.f32.mrf.mxu0 }
 0x30b   : > { %v904_v12 = vadd.f32 %v2503_v63, %v903_v3  ;;  %v1197_v7 = vpack.c.bf16 %v1111_v6, %v1110_v5 }
 0x30d   : > { %v1106_v16 = vmax.f32 %v904_v12, 0.0 }
 0x30e   : > { %v1449_v9 = vpop.f32.mrf.mxu1 }
 0x310   : > { %v2607_v21 = vpop.f32.mrf.mxu3 }
 0x312   : > { %v905_v14 = vpop.f32.mrf.mxu0 }
 0x313   : > { %v906_v15 = vadd.f32 %v2503_v63, %v905_v14 }
 0x315   : > { %v1107_v17 = vmax.f32 %v906_v15, 0.0  ;;  %2052 = vmatmul.msk.bf16.gmra.mxu3 %vm499_vm2, %v462_v28  ;;  %v389_v15 = vld [vmem:[%s2206_s11 + $0x350] sm:$0xff] }
 0x316   : > { %v1452_v46 = vpop.f32.mrf.mxu1 }
 0x317   : > { %v1195_v20 = vpack.c.bf16 %v1107_v17, %v1106_v16  ;;  %v1453_v22 = vadd.f32 %v2565_v8, %v1452_v46  ;;  %v390_v16 = vld [vmem:[%s2206_s11 + $0x358] sm:$0xff]  ;;  %v919_v46 = vadd.f32 %v2503_v63, %v2604_v54 }
 0x318   : > { %v2618_v29 = vpop.f32.mrf.mxu3  ;;  %v464_v17 = vpack.c.bf16 %v390_v16, %v389_v15 }
 0x319   : > { %1491 = vmatmul.bf16.vlgmr.msra.gmra.mxu2 %v1195_v20  ;;  %v1679_v34 = vmax.f32 %v1453_v22, 0.0  ;;  %v921_v20 = vadd.f32 %v2503_v63, %v2607_v21 }
 0x31a   : > { %1842 = vmatpush.bf16.xpose.msra.mxu2 %v2539_v2  ;;  %v1450_v2 = vadd.f32 %v2565_v8, %v1449_v9 }
 0x31b   : > { %v1113_v27 = vmax.f32 %v921_v20, 0.0 }
 0x31c   : > { %v1678_v42 = vmax.f32 %v1450_v2, 0.0  ;;  %v924_v2 = vadd.f32 %v2503_v63, %v2618_v29 }
 0x31e   : > { %v1454_v25 = vpop.f32.mrf.mxu1  ;;  %v1776_v51 = vpack.c.bf16 %v1678_v42, %v1677_v48 }
 0x31f   : > { %v1455_v33 = vadd.f32 %v2565_v8, %v1454_v25 }
 0x320   : > { %v925_v52 = vpop.f32.mrf.mxu3 }
 0x321   : > { %v1680_v19 = vmax.f32 %v1455_v33, 0.0  ;;  %v391_v33 = vld [vmem:[%s2206_s11 + $0x360] sm:$0xff]  ;;  %v926_v10 = vadd.f32 %v2503_v63, %v925_v52 }
 0x322   : > { %1843 = vmatpush.bf16.xpose.msra.mxu2 %v2531_v50  ;;  %v1445_v50 = vadd.f32 %v2565_v8, %v1444_v55  ;;  %v1675_v55 = vmax.f32 %v1443_v53, 0.0 }
 0x323   : > { %v1777_v37 = vpack.c.bf16 %v1680_v19, %v1679_v34  ;;  %v392_v34 = vld [vmem:[%s2206_s11 + $0x368] sm:$0xff] }
 0x324   : > { %v1676_v61 = vmax.f32 %v1445_v50, 0.0  ;;  %v465_v19 = vpack.c.bf16 %v392_v34, %v391_v33  ;;  %v393_v50 = vld [vmem:[%s2206_s11 + $0x370] sm:$0xff] }
 0x325   : > { %1855 = vmatpush.bf16.xpose.msra.mxu3 %v1777_v37  ;;  %v1115_v37 = vmax.f32 %v926_v10, 0.0 }
 0x326   : > { %v1457_v57 = vpop.f32.mrf.mxu1  ;;  %2053 = vmatmul.msk.bf16.gmra.mxu3 %vm499_vm2, %v463_v60  ;;  %v1775_v3 = vpack.c.bf16 %v1676_v61, %v1675_v55  ;;  %v396_v55 = vld [vmem:[%s2206_s11 + $0x388] sm:$0xff] }
 0x327   : > { %v1458_v38 = vadd.f32 %v2565_v8, %v1457_v57 }
 0x328   : > { %v928_v11 = vpop.f32.mrf.mxu3 }
 0x329   : > { %1496 = vmatmul.bf16.gmra.mxu2 %v1196_v43  ;;  %v1681_v1 = vmax.f32 %v1458_v38, 0.0  ;;  %v929_v53 = vadd.f32 %v2503_v63, %v928_v11 }
 0x32a   : > { %1844 = vmatpush.bf16.xpose.msra.mxu2 %v2519_v24 }
 0x32d   : > { %1856 = vmatpush.bf16.xpose.msra.mxu3 %v1776_v51  ;;  %v394_v51 = vld [vmem:[%s2206_s11 + $0x378] sm:$0xff] }
 0x32e   : > { %v1459_v49 = vpop.f32.mrf.mxu1 }
 0x32f   : > { %v1460_v24 = vadd.f32 %v2565_v8, %v1459_v49  ;;  %v1116_v49 = vmax.f32 %v929_v53, 0.0  ;;  %v403_v53 = vld [vmem:[%s2206_s11 + $0x3c0] sm:$0xff] }
 0x330   : > { %v930_v12 = vpop.f32.mrf.mxu3 }
 0x331   : > { %v1682_v44 = vmax.f32 %v1460_v24, 0.0  ;;  %v931_v38 = vadd.f32 %v2503_v63, %v930_v12  ;;  %v395_v24 = vld [vmem:[%s2206_s11 + $0x380] sm:$0xff]  ;;  %v397_v12 = vld [vmem:[%s2206_s11 + $0x390] sm:$0xff] }
 0x332   : > { %1845 = vmatpush.bf16.xpose.msra.mxu2 %v2507_v4 }
 0x333   : > { %v2633_v9 = vpack.c.bf16 %v1682_v44, %v1681_v1  ;;  %v1117_v60 = vmax.f32 %v931_v38, 0.0  ;;  %v467_v1 = vpack.c.bf16 %v396_v55, %v395_v24  ;;  %v404_v38 = vld [vmem:[%s2206_s11 + $0x3c8] sm:$0xff] }
 0x335   : > { %1857 = vmatpush.bf16.xpose.msra.mxu3 %v1775_v3  ;;  %v1200_v62 = vpack.c.bf16 %v1117_v60, %v1116_v49 }
 0x336   : > { %v1462_v45 = vpop.f32.mrf.mxu1  ;;  %2054 = vmatmul.msk.bf16.gmra.mxu3 %vm499_vm2, %v464_v17 }
 0x337   : > { %v1463_v14 = vadd.f32 %v2565_v8, %v1462_v45 }
 0x338   : > { %v933_v28 = vpop.f32.mrf.mxu3 }
 0x339   : > { %1501 = vmatmul.bf16.gmra.mxu2 %v1197_v7  ;;  %v934_v44 = vadd.f32 %v2503_v63, %v933_v28 }
 0x33a   : > { %1846 = vmatpush.bf16.xpose.msra.mxu2 %v2490_v47  ;;  %v1683_v47 = vmax.f32 %v1463_v14, 0.0  ;;  %v398_v14 = vld [vmem:[%s2206_s11 + $0x398] sm:$0xff] }
 0x33b   : > { %v1118_v5 = vmax.f32 %v934_v44, 0.0  ;;  %v468_v15 = vpack.c.bf16 %v398_v14, %v397_v12 }
 0x33d   : > { %1858 = vmatpush.bf16.xpose.msra.mxu3 %v2589_v40  ;;  %v1112_v40 = vmax.f32 %v919_v46, 0.0 }
 0x33e   : > { %v1464_v4 = vpop.f32.mrf.mxu1 }
 0x33f   : > { %v1465_v22 = vadd.f32 %v2565_v8, %v1464_v4  ;;  %v1198_v31 = vpack.c.bf16 %v1113_v27, %v1112_v40  ;;  %v400_v40 = vld [vmem:[%s2206_s11 + $0x3a8] sm:$0xff] }
 0x340   : > { %v935_v21 = vpop.f32.mrf.mxu3 }
 0x341   : > { %v1684_v23 = vmax.f32 %v1465_v22, 0.0  ;;  %v936_v3 = vadd.f32 %v2503_v63, %v935_v21 }
 0x342   : > { %1847 = vmatpush.bf16.xpose.msra.mxu2 %v2479_v30 }
 0x343   : > { %v2647_v25 = vpack.c.bf16 %v1684_v23, %v1683_v47  ;;  %v1119_v6 = vmax.f32 %v936_v3, 0.0  ;;  %v399_v23 = vld [vmem:[%s2206_s11 + $0x3a0] sm:$0xff] }
 0x344   : > { %v469_v27 = vpack.c.bf16 %v400_v40, %v399_v23 }
 0x345   : > { %1859 = vmatpush.bf16.xpose.msra.mxu3 %v2580_v18  ;;  %v1201_v45 = vpack.c.bf16 %v1119_v6, %v1118_v5 }
 0x346   : > { %v1467_v54 = vpop.f32.mrf.mxu1  ;;  %2055 = vmatmul.msk.bf16.gmra.mxu3 %vm499_vm2, %v465_v19  ;;  %v401_v19 = vld [vmem:[%s2206_s11 + $0x3b0] sm:$0xff] }
 0x347   : > { %v1468_v32 = vadd.f32 %v2565_v8, %v1467_v54 }
 0x348   : > { %v938_v57 = vpop.f32.mrf.mxu3 }
 0x349   : > { %1506 = vmatmul.bf16.gmra.mxu2 %v1198_v31  ;;  %v939_v16 = vadd.f32 %v2503_v63, %v938_v57 }
 0x34a   : > { %1848 = vmatpush.bf16.xpose.msra.mxu2 %v2468_v13  ;;  %v1685_v13 = vmax.f32 %v1468_v32, 0.0 }
 0x34b   : > { %v1120_v17 = vmax.f32 %v939_v16, 0.0 }
 0x34d   : > { %1860 = vmatpush.bf16.xpose.msra.mxu3 %v2572_v26  ;;  %v1114_v26 = vmax.f32 %v924_v2, 0.0  ;;  %v402_v2 = vld [vmem:[%s2206_s11 + $0x3b8] sm:$0xff] }
 0x34e   : > { %v1469_v30 = vpop.f32.mrf.mxu1  ;;  %v470_v10 = vpack.c.bf16 %v402_v2, %v401_v19 }
 0x34f   : > { %v1470_v18 = vadd.f32 %v2565_v8, %v1469_v30  ;;  %v1199_v42 = vpack.c.bf16 %v1115_v37, %v1114_v26 }
 0x350   : > { %v940_v43 = vpop.f32.mrf.mxu3 }
 0x351   : > { %v1686_v35 = vmax.f32 %v1470_v18, 0.0  ;;  %v941_v4 = vadd.f32 %v2503_v63, %v940_v43 }
 0x352   : > { %1849 = vmatpush.bf16.xpose.msra.mxu2 %v2458_v59  ;;  %v466_v59 = vpack.c.bf16 %v394_v51, %v393_v50 }
 0x353   : > { %v2661_v39 = vpack.c.bf16 %v1686_v35, %v1685_v13  ;;  %v1121_v46 = vmax.f32 %v941_v4, 0.0 }
 0x355   : > { %1861 = vmatpush.bf16.xpose.msra.mxu3 %v2558_v41  ;;  %v1202_v22 = vpack.c.bf16 %v1121_v46, %v1120_v17 }
 0x356   : > { %v1472_v29 = vpop.f32.mrf.mxu1  ;;  %2056 = vmatmul.msk.bf16.gmra.mxu3 %vm499_vm2, %v466_v59 }
 0x357   : > { %v1473_v48 = vadd.f32 %v2565_v8, %v1472_v29 }
 0x359   : > { %1511 = vmatmul.bf16.gmra.mxu2 %v1199_v42  ;;  %v1687_v56 = vmax.f32 %v1473_v48, 0.0 }
 0x35d   : > { %1862 = vmatpush.bf16.xpose.msra.mxu3 %v2549_v36  ;;  %v943_v36 = vpop.f32.mrf.mxu3 }
 0x35e   : > { %v1474_v52 = vpop.f32.mrf.mxu1  ;;  %v944_v28 = vadd.f32 %v2503_v63, %v943_v36 }
 0x35f   : > { %v1475_v41 = vadd.f32 %v2565_v8, %v1474_v52 }
 0x360   : > { %v1122_v31 = vmax.f32 %v944_v28, 0.0 }
 0x361   : > { %v1688_v58 = vmax.f32 %v1475_v41, 0.0  ;;  %v471_v41 = vpack.c.bf16 %v404_v38, %v403_v53 }
 0x363   : > { %v2672_v61 = vpack.c.bf16 %v1688_v58, %v1687_v56 }
 0x365   : > { %v945_v0 = vpop.f32.mrf.mxu3 }
 0x366   : > { %2057 = vmatmul.msk.bf16.gmra.mxu3 %vm499_vm2, %v467_v1  ;;  %v946_v54 = vadd.f32 %v2503_v63, %v945_v0 }
 0x368   : > { %v1123_v21 = vmax.f32 %v946_v54, 0.0  ;;  %v407_v54 = vld [vmem:[%s2206_s11 + $0x3e0] sm:$0xff] }
 0x369   : > { %1516 = vmatmul.bf16.gmra.mxu2 %v1200_v62 }
 0x36a   : > { %v1203_v33 = vpack.c.bf16 %v1123_v21, %v1122_v31  ;;  %v408_v31 = vld [vmem:[%s2206_s11 + $0x3e8] sm:$0xff] }
 0x36b   : > { %v473_v21 = vpack.c.bf16 %v408_v31, %v407_v54 }
 0x36d   : > { %v948_v11 = vpop.f32.mrf.mxu3 }
 0x36e   : > { %v949_v18 = vadd.f32 %v2503_v63, %v948_v11  ;;  %v405_v11 = vld [vmem:[%s2206_s11 + $0x3d0] sm:$0xff] }
 0x370   : > { %v1124_v35 = vmax.f32 %v949_v18, 0.0 }
 0x375   : > { %v950_v7 = vpop.f32.mrf.mxu3 }
 0x376   : > { %2058 = vmatmul.msk.bf16.gmra.mxu3 %vm499_vm2, %v468_v15  ;;  %v951_v13 = vadd.f32 %v2503_v63, %v950_v7 }
 0x378   : > { %v1125_v26 = vmax.f32 %v951_v13, 0.0 }
 0x379   : > { %1521 = vmatmul.bf16.gmra.mxu2 %v1201_v45  ;;  %v406_v45 = vld [vmem:[%s2206_s11 + $0x3d8] sm:$0xff] }
 0x37a   : > { %v1204_v50 = vpack.c.bf16 %v1125_v26, %v1124_v35  ;;  %v472_v7 = vpack.c.bf16 %v406_v45, %v405_v11 }
 0x37d   : > { %v953_v20 = vpop.f32.mrf.mxu3 }
 0x37e   : > { %v954_v56 = vadd.f32 %v2503_v63, %v953_v20 }
 0x380   : > { %v1126_v49 = vmax.f32 %v954_v56, 0.0 }
 0x385   : > { %v955_v47 = vpop.f32.mrf.mxu3 }
 0x386   : > { %2059 = vmatmul.msk.bf16.gmra.mxu3 %vm499_vm2, %v469_v27  ;;  %v956_v58 = vadd.f32 %v2503_v63, %v955_v47 }
 0x388   : > { %v1127_v60 = vmax.f32 %v956_v58, 0.0 }
 0x389   : > { %1526 = vmatmul.bf16.gmra.mxu2 %v1202_v22 }
 0x38a   : > { %v1205_v44 = vpack.c.bf16 %v1127_v60, %v1126_v49 }
 0x38d   : > { %v958_v32 = vpop.f32.mrf.mxu3 }
 0x38e   : > { %v959_v12 = vadd.f32 %v2503_v63, %v958_v32 }
 0x390   : > { %v1128_v15 = vmax.f32 %v959_v12, 0.0 }
 0x395   : > { %v960_v34 = vpop.f32.mrf.mxu3 }
 0x396   : > { %2060 = vmatmul.msk.bf16.gmra.mxu3 %vm499_vm2, %v470_v10  ;;  %v961_v14 = vadd.f32 %v2503_v63, %v960_v34 }
 0x398   : > { %v1129_v16 = vmax.f32 %v961_v14, 0.0 }
 0x399   : > { %1531 = vmatmul.bf16.gmra.mxu2 %v1203_v33 }
 0x39a   : > { %v1206_v23 = vpack.c.bf16 %v1129_v16, %v1128_v15 }
 0x39c   : > { %v1492_v30 = vpop.f32.mrf.mxu2 }
 0x39d   : > { %v1493_v37 = vadd.f32 %v2565_v8, %v1492_v30  ;;  %v963_v57 = vpop.f32.mrf.mxu3 }
 0x39e   : > { %v964_v32 = vadd.f32 %v2503_v63, %v963_v57 }
 0x39f   : > { %v1695_v43 = vmax.f32 %v1493_v37, 0.0 }
 0x3a0   : > { %v1130_v34 = vmax.f32 %v964_v32, 0.0 }
 0x3a4   : > { %v1494_v29 = vpop.f32.mrf.mxu2 }
 0x3a5   : > { %v1495_v42 = vadd.f32 %v2565_v8, %v1494_v29  ;;  %v965_v52 = vpop.f32.mrf.mxu3 }
 0x3a6   : > { %2061 = vmatmul.msk.bf16.gmra.mxu3 %vm499_vm2, %v471_v41  ;;  %v966_v33 = vadd.f32 %v2503_v63, %v965_v52 }
 0x3a7   : > { %v1696_v48 = vmax.f32 %v1495_v42, 0.0  ;;  %v409_v42 = vld [vmem:[%s2206_s11 + $0x3f0] sm:$0xff] }
 0x3a8   : > { %v1131_v30 = vmax.f32 %v966_v33, 0.0 }
 0x3a9   : > { %v2696_v51 = vpack.c.bf16 %v1696_v48, %v1695_v43  ;;  %1536 = vmatmul.bf16.gmra.mxu2 %v1204_v50  ;;  %v410_v43 = vld [vmem:[%s2206_s11 + $0x3f8] sm:$0xff] }
 0x3aa   : > { %v1207_v26 = vpack.c.bf16 %v1131_v30, %v1130_v34  ;;  %v474_v48 = vpack.c.bf16 %v410_v43, %v409_v42 }
 0x3ac   : > { %v1497_v59 = vpop.f32.mrf.mxu2 }
 0x3ad   : > { %v1498_v36 = vadd.f32 %v2565_v8, %v1497_v59  ;;  %v968_v62 = vpop.f32.mrf.mxu3 }
 0x3ae   : > { %v969_v50 = vadd.f32 %v2503_v63, %v968_v62 }
 0x3af   : > { %v1697_v55 = vmax.f32 %v1498_v36, 0.0 }
 0x3b0   : > { %v1132_v59 = vmax.f32 %v969_v50, 0.0 }
 0x3b4   : > { %v1499_v0 = vpop.f32.mrf.mxu2 }
 0x3b5   : > { %v1500_v24 = vadd.f32 %v2565_v8, %v1499_v0  ;;  %v970_v5 = vpop.f32.mrf.mxu3 }
 0x3b6   : > { %2062 = vmatmul.msk.bf16.gmra.mxu3 %vm499_vm2, %v472_v7  ;;  %v971_v52 = vadd.f32 %v2503_v63, %v970_v5 }
 0x3b7   : > { %v1698_v1 = vmax.f32 %v1500_v24, 0.0 }
 0x3b8   : > { %v1133_v53 = vmax.f32 %v971_v52, 0.0 }
 0x3b9   : > { %1541 = vmatmul.bf16.gmra.mxu2 %v1205_v44  ;;  %v2705_v3 = vpack.c.bf16 %v1698_v1, %v1697_v55 }
 0x3ba   : > { %v1208_v36 = vpack.c.bf16 %v1133_v53, %v1132_v59 }
 0x3bc   : > { %v1502_v6 = vpop.f32.mrf.mxu2 }
 0x3bd   : > { %v1503_v4 = vadd.f32 %v2565_v8, %v1502_v6  ;;  %v973_v17 = vpop.f32.mrf.mxu3 }
 0x3be   : > { %v974_v55 = vadd.f32 %v2503_v63, %v973_v17 }
 0x3bf   : > { %v1699_v22 = vmax.f32 %v1503_v4, 0.0 }
 0x3c0   : > { %v1134_v44 = vmax.f32 %v974_v55, 0.0 }
 0x3c4   : > { %v1504_v46 = vpop.f32.mrf.mxu2 }
 0x3c5   : > { %v1505_v20 = vadd.f32 %v2565_v8, %v1504_v46  ;;  %v975_v27 = vpop.f32.mrf.mxu3 }
 0x3c6   : > { %2063 = vmatmul.msk.bf16.gmra.mxu3 %vm499_vm2, %v473_v21  ;;  %v976_v1 = vadd.f32 %v2503_v63, %v975_v27 }
 0x3c7   : > { %v1700_v47 = vmax.f32 %v1505_v20, 0.0 }
 0x3c8   : > { %v1135_v5 = vmax.f32 %v976_v1, 0.0 }
 0x3c9   : > { %1546 = vmatmul.bf16.gmra.mxu2 %v1206_v23  ;;  %v2714_v40 = vpack.c.bf16 %v1700_v47, %v1699_v22 }
 0x3ca   : > { %v1209_v15 = vpack.c.bf16 %v1135_v5, %v1134_v44 }
 0x3cc   : > { %v1507_v28 = vpop.f32.mrf.mxu2 }
 0x3cd   : > { %v1508_v19 = vadd.f32 %v2565_v8, %v1507_v28  ;;  %v978_v2 = vpop.f32.mrf.mxu3  ;;  %v2745_v28 = vld [vmem:[%s2886_s5] sm:$0xf] }
 0x3ce   : > { %v979_v46 = vadd.f32 %v2503_v63, %v978_v2 }
 0x3cf   : > { %v1701_v13 = vmax.f32 %v1508_v19, 0.0 }
 0x3d0   : > { %v1136_v22 = vmax.f32 %v979_v46, 0.0 }
 0x3d4   : > { %v1509_v10 = vpop.f32.mrf.mxu2 }
 0x3d5   : > { %v1510_v18 = vadd.f32 %v2565_v8, %v1509_v10  ;;  %v980_v57 = vpop.f32.mrf.mxu3 }
 0x3d6   : > { %2064 = vmatmul.msk.bf16.gmra.mxu3 %vm499_vm2, %v474_v48  ;;  %v981_v17 = vadd.f32 %v2503_v63, %v980_v57 }
 0x3d7   : > { %v1702_v35 = vmax.f32 %v1510_v18, 0.0 }
 0x3d8   : > { %v1137_v47 = vmax.f32 %v981_v17, 0.0 }
 0x3d9   : > { %1551 = vmatmul.bf16.gmra.mxu2 %v1207_v26  ;;  %v2723_v37 = vpack.c.bf16 %v1702_v35, %v1701_v13 }
 0x3da   : > { %v1210_v27 = vpack.c.bf16 %v1137_v47, %v1136_v22 }
 0x3dc   : > { %v1512_v29 = vpop.f32.mrf.mxu2 }
 0x3dd   : > { %v1513_v38 = vadd.f32 %v2565_v8, %v1512_v29  ;;  %v983_v41 = vpop.f32.mrf.mxu3 }
 0x3de   : > { %v984_v21 = vadd.f32 %v2503_v63, %v983_v41 }
 0x3df   : > { %v1703_v49 = vmax.f32 %v1513_v38, 0.0 }
 0x3e0   : > { %v1138_v33 = vmax.f32 %v984_v21, 0.0 }
 0x3e4   : > { %v1514_v56 = vpop.f32.mrf.mxu2 }
 0x3e5   : > { %v1515_v58 = vadd.f32 %v2565_v8, %v1514_v56  ;;  %v985_v62 = vpop.f32.mrf.mxu3 }
 0x3e6   : > { %1837 = vmatmul.bf16.vlgmr.msrb.gmra.mxu3 %v2745_v28  ;;  %v986_v32 = vadd.f32 %v2503_v63, %v985_v62 }
 0x3e7   : > { %v1704_v60 = vmax.f32 %v1515_v58, 0.0 }
 0x3e8   : > { %v1139_v34 = vmax.f32 %v986_v32, 0.0 }
 0x3e9   : > { %1556 = vmatmul.bf16.gmra.mxu2 %v1208_v36  ;;  %v2732_v0 = vpack.c.bf16 %v1704_v60, %v1703_v49  ;;  %v2760_v49 = vld [vmem:[%s2883_s2] ss:$0 sm:$0xff] }
 0x3ea   : > { %v1211_v2 = vpack.c.bf16 %v1139_v34, %v1138_v33 }
 0x3ec   : > { %v1517_v24 = vpop.f32.mrf.mxu2 }
 0x3ed   : > { %v1518_v6 = vadd.f32 %v2565_v8, %v1517_v24  ;;  %v988_v7 = vpop.f32.mrf.mxu3 }
 0x3ee   : > { %v989_v13 = vadd.f32 %v2503_v63, %v988_v7 }
 0x3ef   : > { %v1705_v12 = vmax.f32 %v1518_v6, 0.0 }
 0x3f0   : > { %v1140_v26 = vmax.f32 %v989_v13, 0.0 }
 0x3f4   : > { %v1519_v11 = vpop.f32.mrf.mxu2 }
 0x3f5   : > { %v1520_v45 = vadd.f32 %v2565_v8, %v1519_v11  ;;  %v990_v20 = vpop.f32.mrf.mxu3 }
 0x3f6   : > { %1863 = vmatmul.bf16.vlgmr.msra.gmra.mxu3 %v2745_v28  ;;  %v991_v35 = vadd.f32 %v2503_v63, %v990_v20 }
 0x3f7   : > { %v1706_v14 = vmax.f32 %v1520_v45, 0.0 }
 0x3f8   : > { %v1141_v57 = vmax.f32 %v991_v35, 0.0 }
 0x3f9   : > { %1561 = vmatmul.bf16.gmra.mxu2 %v1209_v15  ;;  %v2738_v16 = vpack.c.bf16 %v1706_v14, %v1705_v12 }
 0x3fa   : > { %v1212_v48 = vpack.c.bf16 %v1141_v57, %v1140_v26 }
 0x3fc   : > { %v1522_v4 = vpop.f32.mrf.mxu2 }
 0x3fd   : > { %v993_v54 = vpop.f32.mrf.mxu3  ;;  %v1523_v1 = vadd.f32 %v2565_v8, %v1522_v4 }
 0x3fe   : > { %v994_v60 = vadd.f32 %v2760_v49, %v993_v54 }
 0x3ff   : > { %v1707_v12 = vmax.f32 %v1523_v1, 0.0 }
 0x400   : > { %v1142_v44 = vmax.f32 %v994_v60, 0.0 }
 0x404   : > { %v1524_v23 = vpop.f32.mrf.mxu2 }
 0x405   : > { %v995_v19 = vpop.f32.mrf.mxu3  ;;  %v1525_v24 = vadd.f32 %v2565_v8, %v1524_v23 }
 0x406   : > { %v996_v36 = vadd.f32 %v2760_v49, %v995_v19 }
 0x407   : > { %v1708_v45 = vmax.f32 %v1525_v24, 0.0 }
 0x408   : > { %v1143_v5 = vmax.f32 %v996_v36, 0.0 }
 0x409   : > { %1566 = vmatmul.bf16.gmra.mxu2 %v1210_v27  ;;  %v1791_v17 = vpack.c.bf16 %v1708_v45, %v1707_v12 }
 0x40a   : > { %v1213_v14 = vpack.c.bf16 %v1143_v5, %v1142_v44 }
 0x40c   : > { %v1527_v31 = vpop.f32.mrf.mxu2 }
 0x40d   : > { %v998_v18 = vpop.f32.mrf.mxu3  ;;  %v1528_v41 = vadd.f32 %v2565_v8, %v1527_v31 }
 0x40e   : > { %v999_v47 = vadd.f32 %v2760_v49, %v998_v18 }
 0x40f   : > { %v1709_v58 = vmax.f32 %v1528_v41, 0.0 }
 0x410   : > { %v1144_v27 = vmax.f32 %v999_v47, 0.0 }
 0x414   : > { %v1529_v30 = vpop.f32.mrf.mxu2 }
 0x415   : > { %v1000_v59 = vpop.f32.mrf.mxu3  ;;  %v1530_v53 = vadd.f32 %v2565_v8, %v1529_v30 }
 0x416   : > { %v1001_v23 = vadd.f32 %v2760_v49, %v1000_v59 }
 0x417   : > { %v1710_v63 = vmax.f32 %v1530_v53, 0.0 }
 0x418   : > { %v1145_v54 = vmax.f32 %v1001_v23, 0.0 }
 0x419   : > { %1571 = vmatmul.bf16.gmra.mxu2 %v1211_v2  ;;  %v1792_v62 = vpack.c.bf16 %v1710_v63, %v1709_v58 }
 0x41a   : > { %v1214_v34 = vpack.c.bf16 %v1145_v54, %v1144_v27 }
 0x41c   : > { %v1532_v10 = vpop.f32.mrf.mxu2 }
 0x41d   : > { %v1533_v29 = vadd.f32 %v2565_v8, %v1532_v10  ;;  %v1003_v55 = vpop.f32.mrf.mxu3 }
 0x41e   : > { %v1004_v18 = vadd.f32 %v2760_v49, %v1003_v55 }
 0x41f   : > { %v1711_v50 = vmax.f32 %v1533_v29, 0.0 }
 0x420   : > { %v1146_v26 = vmax.f32 %v1004_v18, 0.0 }
 0x424   : > { %v1534_v42 = vpop.f32.mrf.mxu2 }
 0x425   : > { %v1535_v43 = vadd.f32 %v2565_v8, %v1534_v42  ;;  %v1005_v4 = vpop.f32.mrf.mxu3 }
 0x426   : > { %v1006_v13 = vadd.f32 %v2760_v49, %v1005_v4 }
 0x427   : > { %v1712_v52 = vmax.f32 %v1535_v43, 0.0 }
 0x429   : > { %v1793_v38 = vpack.c.bf16 %v1712_v52, %v1711_v50  ;;  %1576 = vmatmul.bf16.gmra.mxu2 %v1212_v48 }
 0x42b   : > { %1881 = vmatpush.bf16.xpose.msrb.mxu3 %v1793_v38 }
 0x42c   : > { %v1537_v56 = vpop.f32.mrf.mxu2 }
 0x42d   : > { %v1538_v6 = vadd.f32 %v2565_v8, %v1537_v56  ;;  %v1008_v33 = vpop.f32.mrf.mxu3 }
 0x42e   : > { %v1009_v53 = vadd.f32 %v2760_v49, %v1008_v33 }
 0x42f   : > { %v1713_v15 = vmax.f32 %v1538_v6, 0.0  ;;  %v2796_v6 = vpop.f32.mrf.mxu1 }
 0x430   : > { %v1148_v41 = vmax.f32 %v1009_v53, 0.0 }
 0x433   : > { %1882 = vmatpush.bf16.xpose.msrb.mxu3 %v1792_v62 }
 0x434   : > { %v1539_v11 = vpop.f32.mrf.mxu2 }
 0x435   : > { %v1540_v7 = vadd.f32 %v2565_v8, %v1539_v11  ;;  %v1010_v35 = vpop.f32.mrf.mxu3 }
 0x436   : > { %v1011_v38 = vadd.f32 %v2760_v49, %v1010_v35 }
 0x437   : > { %v1714_v46 = vmax.f32 %v1540_v7, 0.0  ;;  %v1479_v47 = vpop.f32.mrf.mxu1 }
 0x438   : > { %v1149_v56 = vmax.f32 %v1011_v38, 0.0  ;;  %v2815_v38 = vld [vmem:[%s2885_s4] ss:$0 sm:$0xff] }
 0x439   : > { %1581 = vmatmul.bf16.gmra.mxu2 %v1213_v14  ;;  %v2768_v20 = vpack.c.bf16 %v1714_v46, %v1713_v15 }
 0x43a   : > { %v1216_v36 = vpack.c.bf16 %v1149_v56, %v1148_v41 }
 0x43b   : > { %1883 = vmatpush.bf16.xpose.msrb.mxu3 %v1791_v17 }
 0x43c   : > { %v1542_v22 = vpop.f32.mrf.mxu2 }
 0x43d   : > { %v1543_v31 = vadd.f32 %v2565_v8, %v1542_v22  ;;  %v1013_v52 = vpop.f32.mrf.mxu3 }
 0x43e   : > { %v1014_v44 = vadd.f32 %v2760_v49, %v1013_v52 }
 0x43f   : > { %v1715_v30 = vmax.f32 %v1543_v31, 0.0 }
 0x443   : > { %1884 = vmatpush.bf16.xpose.msrb.mxu3 %v2738_v16  ;;  %v1147_v16 = vmax.f32 %v1006_v13, 0.0 }
 0x444   : > { %v1544_v21 = vpop.f32.mrf.mxu2 }
 0x445   : > { %v1545_v32 = vadd.f32 %v2565_v8, %v1544_v21  ;;  %v1215_v43 = vpack.c.bf16 %v1147_v16, %v1146_v26  ;;  %v1015_v58 = vpop.f32.mrf.mxu3 }
 0x446   : > { %v1016_v5 = vadd.f32 %v2760_v49, %v1015_v58 }
 0x447   : > { %v1716_v19 = vmax.f32 %v1545_v32, 0.0 }
 0x448   : > { %v1151_v11 = vmax.f32 %v1016_v5, 0.0 }
 0x449   : > { %1586 = vmatmul.bf16.gmra.mxu2 %v1214_v34  ;;  %v2775_v2 = vpack.c.bf16 %v1716_v19, %v1715_v30  ;;  %v1482_v30 = vpop.f32.mrf.mxu1 }
 0x44b   : > { %1885 = vmatpush.bf16.xpose.msrb.mxu3 %v2732_v0 }
 0x44c   : > { %v1547_v10 = vpop.f32.mrf.mxu2 }
 0x44d   : > { %v1548_v57 = vadd.f32 %v2565_v8, %v1547_v10  ;;  %v1018_v1 = vpop.f32.mrf.mxu3 }
 0x44e   : > { %v1019_v23 = vadd.f32 %v2760_v49, %v1018_v1 }
 0x44f   : > { %v1717_v48 = vmax.f32 %v1548_v57, 0.0 }
 0x450   : > { %v1152_v31 = vmax.f32 %v1019_v23, 0.0 }
 0x453   : > { %1886 = vmatpush.bf16.xpose.msrb.mxu3 %v2723_v37 }
 0x454   : > { %v1549_v29 = vpop.f32.mrf.mxu2 }
 0x455   : > { %v1550_v42 = vadd.f32 %v2565_v8, %v1549_v29  ;;  %v1020_v17 = vpop.f32.mrf.mxu3  ;;  %v1484_v29 = vpop.f32.mrf.mxu1 }
 0x456   : > { %v1021_v27 = vadd.f32 %v2760_v49, %v1020_v17  ;;  %v1485_v58 = vadd.f32 %v2815_v38, %v1484_v29 }
 0x457   : > { %v1718_v50 = vmax.f32 %v1550_v42, 0.0 }
 0x458   : > { %v1153_v21 = vmax.f32 %v1021_v27, 0.0 }
 0x459   : > { %1591 = vmatmul.bf16.gmra.mxu2 %v1215_v43  ;;  %v2783_v0 = vpack.c.bf16 %v1718_v50, %v1717_v48 }
 0x45a   : > { %v1218_v19 = vpack.c.bf16 %v1153_v21, %v1152_v31 }
 0x45b   : > { %1887 = vmatpush.bf16.xpose.msrb.mxu3 %v2714_v40 }
 0x45c   : > { %v1552_v59 = vpop.f32.mrf.mxu2 }
 0x45d   : > { %v1553_v37 = vadd.f32 %v2565_v8, %v1552_v59  ;;  %v1023_v54 = vpop.f32.mrf.mxu3 }
 0x45e   : > { %v1024_v16 = vadd.f32 %v2760_v49, %v1023_v54 }
 0x45f   : > { %v1719_v24 = vmax.f32 %v1553_v37, 0.0 }
 0x460   : > { %v1154_v42 = vmax.f32 %v1024_v16, 0.0  ;;  %v2146_v16 = vmov 0  }
 0x461   : > { %2130 = vset.pattern.permute.xlu0 %v2146_v16 }
 0x463   : > { %1888 = vmatpush.bf16.xpose.msrb.mxu3 %v2705_v3  ;;  %v1150_v3 = vmax.f32 %v1014_v44, 0.0 }
 0x464   : > { %v1554_v63 = vpop.f32.mrf.mxu2 }
 0x465   : > { %v1555_v60 = vadd.f32 %v2565_v8, %v1554_v63  ;;  %v1217_v14 = vpack.c.bf16 %v1151_v11, %v1150_v3  ;;  %v1025_v35 = vpop.f32.mrf.mxu3 }
 0x466   : > { %v1026_v57 = vadd.f32 %v2760_v49, %v1025_v35 }
 0x467   : > { %v1720_v62 = vmax.f32 %v1555_v60, 0.0 }
 0x468   : > { %v1155_v43 = vmax.f32 %v1026_v57, 0.0 }
 0x469   : > { %1596 = vmatmul.bf16.gmra.mxu2 %v1216_v36  ;;  %v2791_v40 = vpack.c.bf16 %v1720_v62, %v1719_v24  ;;  %v1483_v36 = vadd.f32 %v2815_v38, %v1482_v30  ;;  %v1692_v62 = vmax.f32 %v1485_v58, 0.0 }
 0x46a   : > { %1889 = vmatmul.bf16.vlgmr.msrb.gmra.mxu3 %v2745_v28  ;;  %v1219_v50 = vpack.c.bf16 %v1155_v43, %v1154_v42 }
 0x46b   : > { %v1691_v44 = vmax.f32 %v1483_v36, 0.0 }
 0x46c   : > { %v1557_v55 = vpop.f32.mrf.mxu2 }
 0x46d   : > { %v1558_v45 = vadd.f32 %v2565_v8, %v1557_v55  ;;  %v1783_v11 = vpack.c.bf16 %v1692_v62, %v1691_v44 }
 0x46f   : > { %v1721_v15 = vmax.f32 %v1558_v45, 0.0 }
 0x474   : > { %v1559_v7 = vpop.f32.mrf.mxu2 }
 0x475   : > { %v1560_v12 = vadd.f32 %v2565_v8, %v1559_v7  ;;  %v1478_v7 = vadd.f32 %v2815_v38, %v2796_v6 }
 0x477   : > { %v1722_v46 = vmax.f32 %v1560_v12, 0.0 }
 0x479   : > { %1601 = vmatmul.bf16.gmra.mxu2 %v1217_v14  ;;  %v2800_v22 = vpack.c.bf16 %v1722_v46, %v1721_v15  ;;  %v1689_v15 = vmax.f32 %v1478_v7, 0.0 }
 0x47c   : > { %v1562_v4 = vpop.f32.mrf.mxu2 }
 0x47d   : > { %v1563_v32 = vadd.f32 %v2565_v8, %v1562_v4 }
 0x47f   : > { %v1723_v10 = vmax.f32 %v1563_v32, 0.0 }
 0x484   : > { %v1564_v33 = vpop.f32.mrf.mxu2 }
 0x485   : > { %v1565_v34 = vadd.f32 %v2565_v8, %v1564_v33  ;;  %v1487_v8 = vpop.f32.mrf.mxu1 }
 0x486   : > { %v1488_v49 = vadd.f32 %v2815_v38, %v1487_v8 }
 0x487   : > { %v1724_v18 = vmax.f32 %v1565_v34, 0.0 }
 0x488   : > { %v1693_v63 = vmax.f32 %v1488_v49, 0.0 }
 0x489   : > { %1606 = vmatmul.bf16.gmra.mxu2 %v1218_v19  ;;  %v2806_v13 = vpack.c.bf16 %v1724_v18, %v1723_v10 }
 0x48c   : > { %v2808_v26 = vpop.f32.mrf.mxu2 }
 0x48d   : > { %v1489_v53 = vpop.f32.mrf.mxu1  ;;  %v1568_v29 = vadd.f32 %v2815_v38, %v2808_v26 }
 0x48e   : > { %v1490_v41 = vadd.f32 %v2815_v38, %v1489_v53 }
 0x490   : > { %v1694_v56 = vmax.f32 %v1490_v41, 0.0 }
 0x492   : > { %v1784_v60 = vpack.c.bf16 %v1694_v56, %v1693_v63 }
 0x494   : > { %v1569_v48 = vpop.f32.mrf.mxu2 }
 0x499   : > { %1611 = vmatmul.bf16.gmra.mxu2 %v1219_v50 }
 0x49c   : > { %v1572_v52 = vpop.f32.mrf.mxu2 }
 0x49d   : > { %v1573_v10 = vadd.f32 %v2815_v38, %v1572_v52  ;;  %v1725_v52 = vmax.f32 %v1568_v29, 0.0 }
 0x49f   : > { %v1727_v35 = vmax.f32 %v1573_v10, 0.0 }
 0x4a4   : > { %v1574_v59 = vpop.f32.mrf.mxu2 }
 0x4a5   : > { %v1575_v30 = vadd.f32 %v2815_v38, %v1574_v59 }
 0x4a9   : > { %1824 = vmatmul.bf16.vlgmr.msrb.gmra.mxu2 %v2745_v28 }
 0x4aa   : > { %1868 = vmatpush.bf16.xpose.msrb.mxu2 %v2696_v51  ;;  %v1480_v51 = vadd.f32 %v2815_v38, %v1479_v47 }
 0x4ac   : > { %v1577_v37 = vpop.f32.mrf.mxu2  ;;  %v1690_v12 = vmax.f32 %v1480_v51, 0.0 }
 0x4ad   : > { %v1578_v24 = vadd.f32 %v2815_v38, %v1577_v37 }
 0x4ae   : > { %v1782_v46 = vpack.c.bf16 %v1690_v12, %v1689_v15 }
 0x4af   : > { %v1729_v5 = vmax.f32 %v1578_v24, 0.0 }
 0x4b2   : > { %1869 = vmatpush.bf16.xpose.msrb.mxu2 %v1784_v60 }
 0x4b4   : > { %v1579_v55 = vpop.f32.mrf.mxu2 }
 0x4b5   : > { %v1580_v1 = vadd.f32 %v2815_v38, %v1579_v55 }
 0x4b7   : > { %v1730_v3 = vmax.f32 %v1580_v1, 0.0 }
 0x4b9   : > { %v2826_v45 = vpack.c.bf16 %v1730_v3, %v1729_v5  ;;  %1850 = vmatmul.bf16.vlgmr.msra.gmra.mxu2 %v2745_v28 }
 0x4ba   : > { %1870 = vmatpush.bf16.xpose.msrb.mxu2 %v1783_v11 }
 0x4bc   : > { %v1582_v14 = vpop.f32.mrf.mxu2 }
 0x4bd   : > { %v1583_v17 = vadd.f32 %v2815_v38, %v1582_v14 }
 0x4bf   : > { %v1731_v47 = vmax.f32 %v1583_v17, 0.0  ;;  %v1838_v17 = vpop.f32.mrf.mxu3 }
 0x4c2   : > { %1871 = vmatpush.bf16.xpose.msrb.mxu2 %v1782_v46 }
 0x4c4   : > { %v1584_v4 = vpop.f32.mrf.mxu2 }
 0x4c5   : > { %v1585_v23 = vadd.f32 %v2815_v38, %v1584_v4 }
 0x4c7   : > { %v1732_v27 = vmax.f32 %v1585_v23, 0.0  ;;  %v1840_v23 = vpop.f32.mrf.mxu3 }
 0x4c9   : > { %v2833_v54 = vpack.c.bf16 %v1732_v27, %v1731_v47 }
 0x4ca   : > { %1872 = vmatpush.bf16.xpose.msrb.mxu2 %v2672_v61  ;;  %v1728_v61 = vmax.f32 %v1575_v30, 0.0 }
 0x4cc   : > { %v1587_v31 = vpop.f32.mrf.mxu2  ;;  %v1801_v57 = vpack.c.bf16 %v1728_v61, %v1727_v35 }
 0x4cd   : > { %v1588_v6 = vadd.f32 %v2815_v38, %v1587_v31 }
 0x4cf   : > { %v1733_v33 = vmax.f32 %v1588_v6, 0.0  ;;  %v1864_v6 = vpop.f32.mrf.mxu3 }
 0x4d2   : > { %1873 = vmatpush.bf16.xpose.msrb.mxu2 %v2661_v39  ;;  %v1570_v39 = vadd.f32 %v2815_v38, %v1569_v48 }
 0x4d4   : > { %v1589_v21 = vpop.f32.mrf.mxu2  ;;  %v1726_v50 = vmax.f32 %v1570_v39, 0.0 }
 0x4d5   : > { %v1590_v32 = vadd.f32 %v2815_v38, %v1589_v21 }
 0x4d7   : > { %v1734_v34 = vmax.f32 %v1590_v32, 0.0 }
 0x4d9   : > { %v2840_v19 = vpack.c.bf16 %v1734_v34, %v1733_v33  ;;  %v1866_v34 = vpop.f32.mrf.mxu3 }
 0x4da   : > { %1874 = vmatpush.bf16.xpose.msrb.mxu2 %v2647_v25  ;;  %v1810_v25 = vld [vmem:[%s2887_s6] sm:$0xff] }
 0x4db   : > { %1813 = vperm.xlu0 %2130, %v1810_v25  }
 0x4dc   : > { %v1592_v18 = vpop.f32.mrf.mxu2 }
 0x4dd   : > { %v1593_v42 = vadd.f32 %v2815_v38, %v1592_v18 }
 0x4df   : > { %v1735_v48 = vmax.f32 %v1593_v42, 0.0 }
 0x4e2   : > { %1875 = vmatpush.bf16.xpose.msrb.mxu2 %v2633_v9  ;;  %v1800_v9 = vpack.c.bf16 %v1726_v50, %v1725_v52 }
 0x4e4   : > { %v1594_v43 = vpop.f32.mrf.mxu2 }
 0x4e5   : > { %v1595_v8 = vadd.f32 %v2815_v38, %v1594_v43 }
 0x4e7   : > { %v1736_v59 = vmax.f32 %v1595_v8, 0.0 }
 0x4e9   : > { %v1805_v53 = vpack.c.bf16 %v1736_v59, %v1735_v48  ;;  %1876 = vmatmul.bf16.vlgmr.msrb.gmra.mxu2 %v2745_v28 }
 0x4ea   : > { %1894 = vmatpush.bf16.xpose.msra.mxu2 %v1801_v57 }
 0x4ec   : > { %v1597_v26 = vpop.f32.mrf.mxu2 }
 0x4ed   : > { %v1598_v41 = vadd.f32 %v2815_v38, %v1597_v26  ;;  %v1890_v30 = vpop.f32.mrf.mxu3 }
 0x4ef   : > { %v1737_v37 = vmax.f32 %v1598_v41, 0.0 }
 0x4f2   : > { %1895 = vmatpush.bf16.xpose.msra.mxu2 %v1800_v9 }
 0x4f4   : > { %v1599_v49 = vpop.f32.mrf.mxu2 }
 0x4f5   : > { %v1600_v56 = vadd.f32 %v2815_v38, %v1599_v49  ;;  %v1892_v61 = vpop.f32.mrf.mxu3 }
 0x4f7   : > { %v1738_v63 = vmax.f32 %v1600_v56, 0.0 }
 0x4f9   : > { %v1806_v58 = vpack.c.bf16 %v1738_v63, %v1737_v37 }
 0x4fa   : > { %1896 = vmatpush.bf16.xpose.msra.mxu2 %v2806_v13 }
 0x4fc   : > { %v1602_v60 = vpop.f32.mrf.mxu2 }
 0x4fd   : > { %v1603_v7 = vadd.f32 %v2815_v38, %v1602_v60 }
 0x4ff   : > { %v1739_v14 = vmax.f32 %v1603_v7, 0.0 }
 0x502   : > { %1897 = vmatpush.bf16.xpose.msra.mxu2 %v2800_v22 }
 0x504   : > { %v1604_v36 = vpop.f32.mrf.mxu2 }
 0x50a   : > { %1898 = vmatpush.bf16.xpose.msra.mxu2 %v2791_v40 }
 0x50c   : > { %v1607_v24 = vpop.f32.mrf.mxu2 }
 0x50d   : > { %v1608_v3 = vadd.f32 %v2815_v38, %v1607_v24 }
 0x50f   : > { %v1741_v51 = vmax.f32 %v1608_v3, 0.0 }
 0x512   : > { %1899 = vmatpush.bf16.xpose.msra.mxu2 %v2783_v0 }
 0x514   : > { %v1609_v62 = vpop.f32.mrf.mxu2 }
 0x515   : > { %v1610_v40 = vadd.f32 %v2815_v38, %v1609_v62 }
 0x51a   : > { %1900 = vmatpush.bf16.xpose.msra.mxu2 %v2775_v2  ;;  %v1742_v2 = vmax.f32 %v1610_v40, 0.0 }
 0x51c   : > { %v1612_v13 = vpop.f32.mrf.mxu2  ;;  %v1808_v11 = vpack.c.bf16 %v1742_v2, %v1741_v51 }
 0x51d   : > { %v1613_v55 = vadd.f32 %v2815_v38, %v1612_v13 }
 0x51f   : > { %v1743_v44 = vmax.f32 %v1613_v55, 0.0 }
 0x522   : > { %1901 = vmatpush.bf16.xpose.msra.mxu2 %v2768_v20  ;;  %v1605_v20 = vadd.f32 %v2815_v38, %v1604_v36 }
 0x524   : > { %v1614_v1 = vpop.f32.mrf.mxu2  ;;  %v1740_v12 = vmax.f32 %v1605_v20, 0.0 }
 0x525   : > { %v1615_v22 = vadd.f32 %v2815_v38, %v1614_v1 }
 0x526   : > { %v1807_v15 = vpack.c.bf16 %v1740_v12, %v1739_v14 }
 0x527   : > { %v1744_v5 = vmax.f32 %v1615_v22, 0.0 }
 0x529   : > { %1902 = vmatmul.bf16.vlgmr.msra.gmra.mxu2 %v2745_v28  ;;  %v1809_v0 = vpack.c.bf16 %v1744_v5, %v1743_v44 }
 0x52b   : > { %1907 = vmatpush.bf16.xpose.msra.mxu3 %v1809_v0 }
 0x52c   : > { %v1825_v46 = vpop.f32.mrf.mxu2 }
 0x533   : > { %1908 = vmatpush.bf16.xpose.msra.mxu3 %v1808_v11 }
 0x534   : > { %v1827_v4 = vpop.f32.mrf.mxu2 }
 0x53b   : > { %1909 = vmatpush.bf16.xpose.msra.mxu3 %v1807_v15 }
 0x53c   : > { %v1851_v31 = vpop.f32.mrf.mxu2 }
 0x543   : > { %1910 = vmatpush.bf16.xpose.msra.mxu3 %v1806_v58 }
 0x544   : > { %v1853_v33 = vpop.f32.mrf.mxu2 }
 0x54b   : > { %1911 = vmatpush.bf16.xpose.msra.mxu3 %v1805_v53 }
 0x54d   : > { %v1814_v47 = vpop.permute.xlu0 %1813 }
 0x54e   : > { %v1826_v38 = vadd.f32 %v1825_v46, %v1814_v47  ;;  %v1839_v27 = vadd.f32 %v1838_v17, %v1814_v47  ;;  %v1852_v21 = vadd.f32 %v1851_v31, %v1814_v47  ;;  %v1865_v32 = vadd.f32 %v1864_v6, %v1814_v47 }
 0x550   : > { %1920 = vst [vmem:[%s280_s8] sm:$0xff] %v1826_v38 }
 0x551   : > { %1921 = vst [vmem:[%s280_s8 + $0x8] sm:$0xff] %v1839_v27 }
 0x552   : > { %1922 = vst [vmem:[%s280_s8 + $0x10] sm:$0xff] %v1852_v21 }
 0x553   : > { %1912 = vmatpush.bf16.xpose.msra.mxu3 %v2840_v19  ;;  %1923 = vst [vmem:[%s280_s8 + $0x18] sm:$0xff] %v1865_v32  ;;  %v1891_v19 = vadd.f32 %v1890_v30, %v1814_v47 }
 0x555   : > { %1925 = vst [vmem:[%s280_s8 + $0x28] sm:$0xff] %v1891_v19 }
 0x55b   : > { %1913 = vmatpush.bf16.xpose.msra.mxu3 %v2833_v54 }
 0x563   : > { %1914 = vmatpush.bf16.xpose.msra.mxu3 %v2826_v45 }
 0x56a   : > { %1915 = vmatmul.bf16.vlgmr.msra.gmra.mxu3 %v2745_v28 }
 0x56c   : > { %v1877_v10 = vpop.f32.mrf.mxu2 }
 0x56d   : > { %v1878_v18 = vadd.f32 %v1877_v10, %v1814_v47 }
 0x56f   : > { %1924 = vst [vmem:[%s280_s8 + $0x20] sm:$0xff] %v1878_v18 }
 0x574   : > { %v1879_v35 = vpop.f32.mrf.mxu2 }
 0x5ac   : > { %v1903_v16 = vpop.f32.mrf.mxu2 }
 0x5ad   : > { %v1904_v54 = vadd.f32 %v1903_v16, %v1814_v47 }
 0x5af   : > { %1926 = vst [vmem:[%s280_s8 + $0x30] sm:$0xff] %v1904_v54 }
 0x5b4   : > { %v1905_v39 = vpop.f32.mrf.mxu2 }
 0x5ed   : > { %v1916_v57 = vpop.f32.mrf.mxu3 }
 0x5ee   : > { %v1917_v29 = vadd.f32 %v1916_v57, %v1814_v47 }
 0x5f0   : > { %1927 = vst [vmem:[%s280_s8 + $0x38] sm:$0xff] %v1917_v29 }
 0x5f5   : > { %v1918_v42 = vpop.f32.mrf.mxu3 }
 0x5f6 PF: > { %s17_s24 = sadd.s32 1, %s2143_s24  }
 0x5f7   : > { %p14_p5 = scmp.ge.s32.totalorder %s17_s24, 5  }
 0x5f9   :  { %16 = sbr.rel (!%p14_p5) target bundleno = 1 (0x1), region = 78 }

</bundles_post_ra>
